<compile_context>
chip_gen: v7x
topology: tpu7x:2x2x1
jax: 0.10.0
libtpu: 0.0.40
codegen_flags: <defaults>
</compile_context>

<pallas_src>
import math
import functools

import jax
import jax.numpy as jnp
from jax.experimental import pallas as pl
from jax.experimental.pallas import tpu as pltpu


# -----------------------------------------------------------------------------
# Fused decoder-layer kernel
# -----------------------------------------------------------------------------

def _decoder_layer_kernel(
    x_ref, enc_ref,
    wqkv_m_ref, bqkv_m_ref, wo_m_ref, bo_m_ref,                     # masked self-attn
    wq_c_ref, bq_c_ref, wkv_c_ref, bkv_c_ref, wo_c_ref, bo_c_ref,   # cross-attn
    norms_ref,                                                      # (6, D): a1,b1,a2,b2,a3,b3
    w1_ref, b1_ref, w2_ref, b2_ref,                                 # feed-forward
    o_ref,
    *, heads, d_k, eps,
):
    D = heads * d_k
    x = x_ref[0]        # (S_trg, D)
    enc = enc_ref[0]    # (S_src, D)
    s_trg = x.shape[0]
    scale = 1.0 / math.sqrt(d_k)

    def attn_core(q_all, k_all, v_all, keep_mask):
        """Multi-head scaled-dot-product attention; returns lane-dense (Lq, D).

        q_all is expected to be pre-scaled by 1/sqrt(d_k).
        """
        outs = []
        for h in range(heads):
            sl = slice(h * d_k, (h + 1) * d_k)
            q_h, k_h, v_h = q_all[:, sl], k_all[:, sl], v_all[:, sl]
            s = jax.lax.dot_general(
                q_h, k_h, (((1,), (1,)), ((), ())),
                preferred_element_type=jnp.float32)
            if keep_mask is not None:
                s = jnp.where(keep_mask, s, -1e9)
            s = s - jnp.max(s, axis=-1, keepdims=True)
            p = jnp.exp(s)
            p = p * pl.reciprocal(jnp.sum(p, axis=-1, keepdims=True), approx=True)
            outs.append(jnp.dot(p, v_h, preferred_element_type=jnp.float32))
        return jnp.concatenate(outs, axis=-1)

    def res_norm(val, residual, alpha, bias):
        t = val + residual
        mean = jnp.mean(t, axis=-1, keepdims=True)
        # torch.std uses Bessel's correction (D-1); eps is added to std, not var.
        var = jnp.sum((t - mean) ** 2, axis=-1, keepdims=True) * (1.0 / (D - 1.0))
        inv = pl.reciprocal(jnp.sqrt(var) + eps, approx=True)
        return alpha * (t - mean) * inv + bias

    # ----- masked (causal) self-attention ------------------------------------
    qkv = jnp.dot(x, wqkv_m_ref[...],
                  preferred_element_type=jnp.float32) + bqkv_m_ref[...]
    row = jax.lax.broadcasted_iota(jnp.int32, (s_trg, s_trg), 0)
    col = jax.lax.broadcasted_iota(jnp.int32, (s_trg, s_trg), 1)
    causal = col <= row
    sa = attn_core(qkv[:, :D] * scale, qkv[:, D:2 * D], qkv[:, 2 * D:], causal)
    sa = jnp.dot(sa, wo_m_ref[...],
                 preferred_element_type=jnp.float32) + bo_m_ref[...]
    n1 = res_norm(sa, x, norms_ref[0:1, :], norms_ref[1:2, :])

    # ----- encoder-decoder cross-attention (src_mask == None) ----------------
    q_c = jnp.dot(n1, wq_c_ref[...],
                  preferred_element_type=jnp.float32) + bq_c_ref[...]
    kv_c = jnp.dot(enc, wkv_c_ref[...],
                   preferred_element_type=jnp.float32) + bkv_c_ref[...]
    ca = attn_core(q_c * scale, kv_c[:, :D], kv_c[:, D:], None)
    ca = jnp.dot(ca, wo_c_ref[...],
                 preferred_element_type=jnp.float32) + bo_c_ref[...]
    n2 = res_norm(ca, n1, norms_ref[2:3, :], norms_ref[3:4, :])

    # ----- feed forward -------------------------------------------------------
    hdn = jnp.maximum(
        jnp.dot(n2, w1_ref[...], preferred_element_type=jnp.float32) + b1_ref[...],
        0.0)
    ff = jnp.dot(hdn, w2_ref[...],
                 preferred_element_type=jnp.float32) + b2_ref[...]
    n3 = res_norm(ff, n2, norms_ref[4:5, :], norms_ref[5:6, :])

    o_ref[0] = n3


def decoder_layer_forward(params, x, enc_out, *, heads, eps=1e-6):
    """Fused DecoderLayer forward.  x: (B, S_trg, D); enc_out: (B, S_src, D)."""
    B, S_trg, D = x.shape
    S_src = enc_out.shape[1]
    d_ff = params["w1"].shape[1]
    d_k = D // heads

    kern = functools.partial(_decoder_layer_kernel, heads=heads, d_k=d_k, eps=eps)

    def full(shape):
        # whole-array block, same for every grid step (stays VMEM-resident)
        return pl.BlockSpec(shape, lambda b, _n=len(shape): (0,) * _n)

    return pl.pallas_call(
        kern,
        out_shape=jax.ShapeDtypeStruct((B, S_trg, D), jnp.float32),
        grid=(B,),
        in_specs=[
            pl.BlockSpec((1, S_trg, D), lambda b: (b, 0, 0)),
            pl.BlockSpec((1, S_src, D), lambda b: (b, 0, 0)),
            full((D, 3 * D)), full((1, 3 * D)), full((D, D)), full((1, D)),
            full((D, D)), full((1, D)), full((D, 2 * D)), full((1, 2 * D)),
            full((D, D)), full((1, D)),
            full((6, D)),
            full((D, d_ff)), full((1, d_ff)), full((d_ff, D)), full((1, D)),
        ],
        out_specs=pl.BlockSpec((1, S_trg, D), lambda b: (b, 0, 0)),
        compiler_params=pltpu.CompilerParams(
            dimension_semantics=("parallel",)),
    )(
        x, enc_out,
        params["wqkv_m"], params["bqkv_m"], params["wo_m"], params["bo_m"],
        params["wq_c"], params["bq_c"], params["wkv_c"], params["bkv_c"],
        params["wo_c"], params["bo_c"],
        params["norms"],
        params["w1"], params["b1"], params["w2"], params["b2"],
    )


# -----------------------------------------------------------------------------
# Parameter init (deterministic, xavier-uniform weights; torch-default norms)
# -----------------------------------------------------------------------------

def _xavier(key, shape):
    fan_in, fan_out = shape
    bound = math.sqrt(6.0 / (fan_in + fan_out))
    return jax.random.uniform(key, shape, jnp.float32, -bound, bound)


def init_decoder_layer(key, d_model, d_ff):
    ks = iter(jax.random.split(key, 32))

    def lin(i, o):
        w = _xavier(next(ks), (i, o))
        b = jax.random.uniform(next(ks), (1, o), jnp.float32, -0.05, 0.05)
        return w, b

    wq_m, bq_m = lin(d_model, d_model)
    wk_m, bk_m = lin(d_model, d_model)
    wv_m, bv_m = lin(d_model, d_model)
    wo_m, bo_m = lin(d_model, d_model)
    wq_c, bq_c = lin(d_model, d_model)
    wk_c, bk_c = lin(d_model, d_model)
    wv_c, bv_c = lin(d_model, d_model)
    wo_c, bo_c = lin(d_model, d_model)
    w1, b1 = lin(d_model, d_ff)
    w2, b2 = lin(d_ff, d_model)

    ones = jnp.ones((d_model,), jnp.float32)
    zeros = jnp.zeros((d_model,), jnp.float32)
    norms = jnp.stack([ones, zeros, ones, zeros, ones, zeros])  # (6, D)

    return dict(
        wqkv_m=jnp.concatenate([wq_m, wk_m, wv_m], axis=1),
        bqkv_m=jnp.concatenate([bq_m, bk_m, bv_m], axis=1),
        wo_m=wo_m, bo_m=bo_m,
        wq_c=wq_c, bq_c=bq_c,
        wkv_c=jnp.concatenate([wk_c, wv_c], axis=1),
        bkv_c=jnp.concatenate([bk_c, bv_c], axis=1),
        wo_c=wo_c, bo_c=bo_c,
        norms=norms,
        w1=w1, b1=b1, w2=w2, b2=b2,
    )


# -----------------------------------------------------------------------------
# Pure-JAX reference (for sanity check)
# -----------------------------------------------------------------------------

def decoder_layer_reference(params, x, enc_out, heads, eps=1e-6):
    B, S_trg, D = x.shape
    d_k = D // heads

    def split_heads(t):
        return t.reshape(t.shape[0], t.shape[1], heads, d_k).transpose(0, 2, 1, 3)

    def mha(q_in, k_in, v_in, wq, bq, wk, bk, wv, bv, wo, bo, mask):
        Q = split_heads(q_in @ wq + bq)
        K = split_heads(k_in @ wk + bk)
        V = split_heads(v_in @ wv + bv)
        s = jnp.einsum("bhqd,bhkd->bhqk", Q, K) / math.sqrt(d_k)
        if mask is not None:
            s = jnp.where(mask, s, -1e9)
        p = jax.nn.softmax(s, axis=-1)
        out = jnp.einsum("bhqk,bhkd->bhqd", p, V)
        out = out.transpose(0, 2, 1, 3).reshape(B, -1, D)
        return out @ wo + bo

    def res_norm(v, r, alpha, bias):
        t = v + r
        mean = t.mean(-1, keepdims=True)
        std = jnp.sqrt(((t - mean) ** 2).sum(-1, keepdims=True) / (D - 1.0))
        return alpha * (t - mean) / (std + eps) + bias

    wqkv, bqkv = params["wqkv_m"], params["bqkv_m"]
    causal = jnp.tril(jnp.ones((S_trg, S_trg), bool))[None, None]
    sa = mha(x, x, x,
             wqkv[:, :D], bqkv[:, :D], wqkv[:, D:2 * D], bqkv[:, D:2 * D],
             wqkv[:, 2 * D:], bqkv[:, 2 * D:],
             params["wo_m"], params["bo_m"], causal)
    n = params["norms"]
    n1 = res_norm(sa, x, n[0], n[1])

    wkv, bkv = params["wkv_c"], params["bkv_c"]
    ca = mha(n1, enc_out, enc_out,
             params["wq_c"], params["bq_c"],
             wkv[:, :D], bkv[:, :D], wkv[:, D:], bkv[:, D:],
             params["wo_c"], params["bo_c"], None)
    n2 = res_norm(ca, n1, n[2], n[3])

    h = jax.nn.relu(n2 @ params["w1"] + params["b1"])
    ff = h @ params["w2"] + params["b2"]
    return res_norm(ff, n2, n[4], n[5])


# -----------------------------------------------------------------------------
# main
# -----------------------------------------------------------------------------

if __name__ == "__main__":
    D_MODEL, HEADS, D_FF = 32, 8, 64          # d_k = 4
    B, S_TRG, S_SRC = 2, 8, 10

    root = jax.random.PRNGKey(0)
    k_p, k_x, k_e = jax.random.split(root, 3)

    params = init_decoder_layer(k_p, D_MODEL, D_FF)
    x = jax.random.normal(k_x, (B, S_TRG, D_MODEL), jnp.float32)
    enc_out = jax.random.normal(k_e, (B, S_SRC, D_MODEL), jnp.float32)

    fwd = jax.jit(functools.partial(decoder_layer_forward, heads=HEADS))
    out = jax.block_until_ready(fwd(params, x, enc_out))

    assert out.shape == (B, S_TRG, D_MODEL)
    assert bool(jnp.all(jnp.isfinite(out)))

    ref = decoder_layer_reference(params, x, enc_out, HEADS)
    max_err = float(jnp.max(jnp.abs(out - ref)))
    assert max_err < 5e-2, f"mismatch vs reference: {max_err}"

    print("KERNEL_OK")
</pallas_src>

<mosaic_0001>
module attributes {stable_mosaic.version = 11 : i64} {
  func.func @_decoder_layer_kernel(%arg0: i32, %arg1: memref<1x8x32xf32, #tpu.memory_space<vmem>>, %arg2: memref<1x10x32xf32, #tpu.memory_space<vmem>>, %arg3: memref<32x96xf32, #tpu.memory_space<vmem>>, %arg4: memref<1x96xf32, #tpu.memory_space<vmem>>, %arg5: memref<32x32xf32, #tpu.memory_space<vmem>>, %arg6: memref<1x32xf32, #tpu.memory_space<vmem>>, %arg7: memref<32x32xf32, #tpu.memory_space<vmem>>, %arg8: memref<1x32xf32, #tpu.memory_space<vmem>>, %arg9: memref<32x64xf32, #tpu.memory_space<vmem>>, %arg10: memref<1x64xf32, #tpu.memory_space<vmem>>, %arg11: memref<32x32xf32, #tpu.memory_space<vmem>>, %arg12: memref<1x32xf32, #tpu.memory_space<vmem>>, %arg13: memref<6x32xf32, #tpu.memory_space<vmem>>, %arg14: memref<32x64xf32, #tpu.memory_space<vmem>>, %arg15: memref<1x64xf32, #tpu.memory_space<vmem>>, %arg16: memref<64x32xf32, #tpu.memory_space<vmem>>, %arg17: memref<1x32xf32, #tpu.memory_space<vmem>>, %arg18: memref<1x8x32xf32, #tpu.memory_space<vmem>>) attributes {dimension_semantics = [#tpu.dimension_semantics<parallel>], iteration_bounds = array<i64: 2>, scalar_prefetch = 0 : i64, scratch_operands = 0 : i64, tpu.core_type = #tpu.core_type<tc>, window_params = [{transform_indices = @transform_0, window_bounds = array<i64: 1, 8, 32>}, {transform_indices = @transform_1, window_bounds = array<i64: 1, 10, 32>}, {pipeline_mode = #tpu.pipeline_mode<synchronous>, transform_indices = @transform_2, window_bounds = array<i64: 32, 96>}, {pipeline_mode = #tpu.pipeline_mode<synchronous>, transform_indices = @transform_3, window_bounds = array<i64: 1, 96>}, {pipeline_mode = #tpu.pipeline_mode<synchronous>, transform_indices = @transform_4, window_bounds = array<i64: 32, 32>}, {pipeline_mode = #tpu.pipeline_mode<synchronous>, transform_indices = @transform_5, window_bounds = array<i64: 1, 32>}, {pipeline_mode = #tpu.pipeline_mode<synchronous>, transform_indices = @transform_6, window_bounds = array<i64: 32, 32>}, {pipeline_mode = #tpu.pipeline_mode<synchronous>, transform_indices = @transform_7, window_bounds = array<i64: 1, 32>}, {pipeline_mode = #tpu.pipeline_mode<synchronous>, transform_indices = @transform_8, window_bounds = array<i64: 32, 64>}, {pipeline_mode = #tpu.pipeline_mode<synchronous>, transform_indices = @transform_9, window_bounds = array<i64: 1, 64>}, {pipeline_mode = #tpu.pipeline_mode<synchronous>, transform_indices = @transform_10, window_bounds = array<i64: 32, 32>}, {pipeline_mode = #tpu.pipeline_mode<synchronous>, transform_indices = @transform_11, window_bounds = array<i64: 1, 32>}, {pipeline_mode = #tpu.pipeline_mode<synchronous>, transform_indices = @transform_12, window_bounds = array<i64: 6, 32>}, {pipeline_mode = #tpu.pipeline_mode<synchronous>, transform_indices = @transform_13, window_bounds = array<i64: 32, 64>}, {pipeline_mode = #tpu.pipeline_mode<synchronous>, transform_indices = @transform_14, window_bounds = array<i64: 1, 64>}, {pipeline_mode = #tpu.pipeline_mode<synchronous>, transform_indices = @transform_15, window_bounds = array<i64: 64, 32>}, {pipeline_mode = #tpu.pipeline_mode<synchronous>, transform_indices = @transform_16, window_bounds = array<i64: 1, 32>}, {transform_indices = @transform_17, window_bounds = array<i64: 1, 8, 32>}]} {
    %c0 = arith.constant 0 : index
    %c0_0 = arith.constant 0 : index
    %c0_1 = arith.constant 0 : index
    %0 = vector.load %arg1[%c0, %c0_0, %c0_1] : memref<1x8x32xf32, #tpu.memory_space<vmem>>, vector<1x8x32xf32>
    %1 = vector.shape_cast %0 : vector<1x8x32xf32> to vector<8x32xf32>
    %c0_2 = arith.constant 0 : index
    %c0_3 = arith.constant 0 : index
    %c0_4 = arith.constant 0 : index
    %2 = vector.load %arg2[%c0_2, %c0_3, %c0_4] : memref<1x10x32xf32, #tpu.memory_space<vmem>>, vector<1x10x32xf32>
    %3 = vector.shape_cast %2 : vector<1x10x32xf32> to vector<10x32xf32>
    %c0_5 = arith.constant 0 : index
    %c0_6 = arith.constant 0 : index
    %4 = vector.load %arg3[%c0_5, %c0_6] : memref<32x96xf32, #tpu.memory_space<vmem>>, vector<32x96xf32>
    %cst = arith.constant dense<0.000000e+00> : vector<8x96xf32>
    %5 = tpu.matmul %1, %4, %cst {dimension_numbers = #tpu.dot_dimension_numbers<[1], [0], [0], [1], [0, 0, 1, 1], [], []>} : vector<8x32xf32>, vector<32x96xf32>, vector<8x96xf32> -> vector<8x96xf32>
    %c0_7 = arith.constant 0 : index
    %c0_8 = arith.constant 0 : index
    %6 = vector.load %arg4[%c0_7, %c0_8] : memref<1x96xf32, #tpu.memory_space<vmem>>, vector<1x96xf32>
    %7 = vector.broadcast %6 : vector<1x96xf32> to vector<8x96xf32>
    %8 = arith.addf %5, %7 : vector<8x96xf32>
    %9 = tpu.iota {dimensions = array<i32: 0>} : vector<8x8xi32>
    %10 = tpu.iota {dimensions = array<i32: 1>} : vector<8x8xi32>
    %11 = arith.cmpi sle, %10, %9 : vector<8x8xi32>
    %12 = vector.extract_strided_slice %8 {offsets = [0, 0], sizes = [8, 32], strides = [1, 1]} : vector<8x96xf32> to vector<8x32xf32>
    %cst_9 = arith.constant 5.000000e-01 : f32
    %13 = vector.broadcast %cst_9 : f32 to vector<8x32xf32>
    %14 = arith.mulf %12, %13 : vector<8x32xf32>
    %15 = vector.extract_strided_slice %8 {offsets = [0, 32], sizes = [8, 32], strides = [1, 1]} : vector<8x96xf32> to vector<8x32xf32>
    %16 = vector.extract_strided_slice %8 {offsets = [0, 64], sizes = [8, 32], strides = [1, 1]} : vector<8x96xf32> to vector<8x32xf32>
    %17 = vector.extract_strided_slice %14 {offsets = [0, 0], sizes = [8, 4], strides = [1, 1]} : vector<8x32xf32> to vector<8x4xf32>
    %18 = vector.extract_strided_slice %15 {offsets = [0, 0], sizes = [8, 4], strides = [1, 1]} : vector<8x32xf32> to vector<8x4xf32>
    %19 = vector.extract_strided_slice %16 {offsets = [0, 0], sizes = [8, 4], strides = [1, 1]} : vector<8x32xf32> to vector<8x4xf32>
    %cst_10 = arith.constant dense<0.000000e+00> : vector<8x8xf32>
    %20 = tpu.matmul %17, %18, %cst_10 {dimension_numbers = #tpu.dot_dimension_numbers<[1], [1], [0], [0], [0, 0, 1, 0], [], []>} : vector<8x4xf32>, vector<8x4xf32>, vector<8x8xf32> -> vector<8x8xf32>
    %cst_11 = arith.constant -1.000000e+09 : f32
    %21 = vector.broadcast %cst_11 : f32 to vector<8x8xf32>
    %22 = arith.select %11, %20, %21 : vector<8x8xi1>, vector<8x8xf32>
    %cst_12 = arith.constant dense<0xFF800000> : vector<8xf32>
    %23 = vector.multi_reduction <maximumf>, %22, %cst_12 [1] : vector<8x8xf32> to vector<8xf32>
    %24 = vector.shape_cast %23 : vector<8xf32> to vector<8x1xf32>
    %25 = vector.broadcast %24 : vector<8x1xf32> to vector<8x8xf32>
    %26 = arith.subf %22, %25 : vector<8x8xf32>
    %27 = math.exp %26 : vector<8x8xf32>
    %cst_13 = arith.constant dense<0.000000e+00> : vector<8xf32>
    %28 = vector.multi_reduction <add>, %27, %cst_13 [1] : vector<8x8xf32> to vector<8xf32>
    %29 = vector.shape_cast %28 : vector<8xf32> to vector<8x1xf32>
    %30 = tpu.reciprocal %29 {approx = true} : vector<8x1xf32> -> vector<8x1xf32>
    %31 = vector.broadcast %30 : vector<8x1xf32> to vector<8x8xf32>
    %32 = arith.mulf %27, %31 : vector<8x8xf32>
    %cst_14 = arith.constant dense<0.000000e+00> : vector<8x4xf32>
    %33 = tpu.matmul %32, %19, %cst_14 {dimension_numbers = #tpu.dot_dimension_numbers<[1], [0], [0], [1], [0, 0, 1, 1], [], []>} : vector<8x8xf32>, vector<8x4xf32>, vector<8x4xf32> -> vector<8x4xf32>
    %34 = vector.extract_strided_slice %14 {offsets = [0, 4], sizes = [8, 4], strides = [1, 1]} : vector<8x32xf32> to vector<8x4xf32>
    %35 = vector.extract_strided_slice %15 {offsets = [0, 4], sizes = [8, 4], strides = [1, 1]} : vector<8x32xf32> to vector<8x4xf32>
    %36 = vector.extract_strided_slice %16 {offsets = [0, 4], sizes = [8, 4], strides = [1, 1]} : vector<8x32xf32> to vector<8x4xf32>
    %cst_15 = arith.constant dense<0.000000e+00> : vector<8x8xf32>
    %37 = tpu.matmul %34, %35, %cst_15 {dimension_numbers = #tpu.dot_dimension_numbers<[1], [1], [0], [0], [0, 0, 1, 0], [], []>} : vector<8x4xf32>, vector<8x4xf32>, vector<8x8xf32> -> vector<8x8xf32>
    %cst_16 = arith.constant -1.000000e+09 : f32
    %38 = vector.broadcast %cst_16 : f32 to vector<8x8xf32>
    %39 = arith.select %11, %37, %38 : vector<8x8xi1>, vector<8x8xf32>
    %cst_17 = arith.constant dense<0xFF800000> : vector<8xf32>
    %40 = vector.multi_reduction <maximumf>, %39, %cst_17 [1] : vector<8x8xf32> to vector<8xf32>
    %41 = vector.shape_cast %40 : vector<8xf32> to vector<8x1xf32>
    %42 = vector.broadcast %41 : vector<8x1xf32> to vector<8x8xf32>
    %43 = arith.subf %39, %42 : vector<8x8xf32>
    %44 = math.exp %43 : vector<8x8xf32>
    %cst_18 = arith.constant dense<0.000000e+00> : vector<8xf32>
    %45 = vector.multi_reduction <add>, %44, %cst_18 [1] : vector<8x8xf32> to vector<8xf32>
    %46 = vector.shape_cast %45 : vector<8xf32> to vector<8x1xf32>
    %47 = tpu.reciprocal %46 {approx = true} : vector<8x1xf32> -> vector<8x1xf32>
    %48 = vector.broadcast %47 : vector<8x1xf32> to vector<8x8xf32>
    %49 = arith.mulf %44, %48 : vector<8x8xf32>
    %cst_19 = arith.constant dense<0.000000e+00> : vector<8x4xf32>
    %50 = tpu.matmul %49, %36, %cst_19 {dimension_numbers = #tpu.dot_dimension_numbers<[1], [0], [0], [1], [0, 0, 1, 1], [], []>} : vector<8x8xf32>, vector<8x4xf32>, vector<8x4xf32> -> vector<8x4xf32>
    %51 = vector.extract_strided_slice %14 {offsets = [0, 8], sizes = [8, 4], strides = [1, 1]} : vector<8x32xf32> to vector<8x4xf32>
    %52 = vector.extract_strided_slice %15 {offsets = [0, 8], sizes = [8, 4], strides = [1, 1]} : vector<8x32xf32> to vector<8x4xf32>
    %53 = vector.extract_strided_slice %16 {offsets = [0, 8], sizes = [8, 4], strides = [1, 1]} : vector<8x32xf32> to vector<8x4xf32>
    %cst_20 = arith.constant dense<0.000000e+00> : vector<8x8xf32>
    %54 = tpu.matmul %51, %52, %cst_20 {dimension_numbers = #tpu.dot_dimension_numbers<[1], [1], [0], [0], [0, 0, 1, 0], [], []>} : vector<8x4xf32>, vector<8x4xf32>, vector<8x8xf32> -> vector<8x8xf32>
    %cst_21 = arith.constant -1.000000e+09 : f32
    %55 = vector.broadcast %cst_21 : f32 to vector<8x8xf32>
    %56 = arith.select %11, %54, %55 : vector<8x8xi1>, vector<8x8xf32>
    %cst_22 = arith.constant dense<0xFF800000> : vector<8xf32>
    %57 = vector.multi_reduction <maximumf>, %56, %cst_22 [1] : vector<8x8xf32> to vector<8xf32>
    %58 = vector.shape_cast %57 : vector<8xf32> to vector<8x1xf32>
    %59 = vector.broadcast %58 : vector<8x1xf32> to vector<8x8xf32>
    %60 = arith.subf %56, %59 : vector<8x8xf32>
    %61 = math.exp %60 : vector<8x8xf32>
    %cst_23 = arith.constant dense<0.000000e+00> : vector<8xf32>
    %62 = vector.multi_reduction <add>, %61, %cst_23 [1] : vector<8x8xf32> to vector<8xf32>
    %63 = vector.shape_cast %62 : vector<8xf32> to vector<8x1xf32>
    %64 = tpu.reciprocal %63 {approx = true} : vector<8x1xf32> -> vector<8x1xf32>
    %65 = vector.broadcast %64 : vector<8x1xf32> to vector<8x8xf32>
    %66 = arith.mulf %61, %65 : vector<8x8xf32>
    %cst_24 = arith.constant dense<0.000000e+00> : vector<8x4xf32>
    %67 = tpu.matmul %66, %53, %cst_24 {dimension_numbers = #tpu.dot_dimension_numbers<[1], [0], [0], [1], [0, 0, 1, 1], [], []>} : vector<8x8xf32>, vector<8x4xf32>, vector<8x4xf32> -> vector<8x4xf32>
    %68 = vector.extract_strided_slice %14 {offsets = [0, 12], sizes = [8, 4], strides = [1, 1]} : vector<8x32xf32> to vector<8x4xf32>
    %69 = vector.extract_strided_slice %15 {offsets = [0, 12], sizes = [8, 4], strides = [1, 1]} : vector<8x32xf32> to vector<8x4xf32>
    %70 = vector.extract_strided_slice %16 {offsets = [0, 12], sizes = [8, 4], strides = [1, 1]} : vector<8x32xf32> to vector<8x4xf32>
    %cst_25 = arith.constant dense<0.000000e+00> : vector<8x8xf32>
    %71 = tpu.matmul %68, %69, %cst_25 {dimension_numbers = #tpu.dot_dimension_numbers<[1], [1], [0], [0], [0, 0, 1, 0], [], []>} : vector<8x4xf32>, vector<8x4xf32>, vector<8x8xf32> -> vector<8x8xf32>
    %cst_26 = arith.constant -1.000000e+09 : f32
    %72 = vector.broadcast %cst_26 : f32 to vector<8x8xf32>
    %73 = arith.select %11, %71, %72 : vector<8x8xi1>, vector<8x8xf32>
    %cst_27 = arith.constant dense<0xFF800000> : vector<8xf32>
    %74 = vector.multi_reduction <maximumf>, %73, %cst_27 [1] : vector<8x8xf32> to vector<8xf32>
    %75 = vector.shape_cast %74 : vector<8xf32> to vector<8x1xf32>
    %76 = vector.broadcast %75 : vector<8x1xf32> to vector<8x8xf32>
    %77 = arith.subf %73, %76 : vector<8x8xf32>
    %78 = math.exp %77 : vector<8x8xf32>
    %cst_28 = arith.constant dense<0.000000e+00> : vector<8xf32>
    %79 = vector.multi_reduction <add>, %78, %cst_28 [1] : vector<8x8xf32> to vector<8xf32>
    %80 = vector.shape_cast %79 : vector<8xf32> to vector<8x1xf32>
    %81 = tpu.reciprocal %80 {approx = true} : vector<8x1xf32> -> vector<8x1xf32>
    %82 = vector.broadcast %81 : vector<8x1xf32> to vector<8x8xf32>
    %83 = arith.mulf %78, %82 : vector<8x8xf32>
    %cst_29 = arith.constant dense<0.000000e+00> : vector<8x4xf32>
    %84 = tpu.matmul %83, %70, %cst_29 {dimension_numbers = #tpu.dot_dimension_numbers<[1], [0], [0], [1], [0, 0, 1, 1], [], []>} : vector<8x8xf32>, vector<8x4xf32>, vector<8x4xf32> -> vector<8x4xf32>
    %85 = vector.extract_strided_slice %14 {offsets = [0, 16], sizes = [8, 4], strides = [1, 1]} : vector<8x32xf32> to vector<8x4xf32>
    %86 = vector.extract_strided_slice %15 {offsets = [0, 16], sizes = [8, 4], strides = [1, 1]} : vector<8x32xf32> to vector<8x4xf32>
    %87 = vector.extract_strided_slice %16 {offsets = [0, 16], sizes = [8, 4], strides = [1, 1]} : vector<8x32xf32> to vector<8x4xf32>
    %cst_30 = arith.constant dense<0.000000e+00> : vector<8x8xf32>
    %88 = tpu.matmul %85, %86, %cst_30 {dimension_numbers = #tpu.dot_dimension_numbers<[1], [1], [0], [0], [0, 0, 1, 0], [], []>} : vector<8x4xf32>, vector<8x4xf32>, vector<8x8xf32> -> vector<8x8xf32>
    %cst_31 = arith.constant -1.000000e+09 : f32
    %89 = vector.broadcast %cst_31 : f32 to vector<8x8xf32>
    %90 = arith.select %11, %88, %89 : vector<8x8xi1>, vector<8x8xf32>
    %cst_32 = arith.constant dense<0xFF800000> : vector<8xf32>
    %91 = vector.multi_reduction <maximumf>, %90, %cst_32 [1] : vector<8x8xf32> to vector<8xf32>
    %92 = vector.shape_cast %91 : vector<8xf32> to vector<8x1xf32>
    %93 = vector.broadcast %92 : vector<8x1xf32> to vector<8x8xf32>
    %94 = arith.subf %90, %93 : vector<8x8xf32>
    %95 = math.exp %94 : vector<8x8xf32>
    %cst_33 = arith.constant dense<0.000000e+00> : vector<8xf32>
    %96 = vector.multi_reduction <add>, %95, %cst_33 [1] : vector<8x8xf32> to vector<8xf32>
    %97 = vector.shape_cast %96 : vector<8xf32> to vector<8x1xf32>
    %98 = tpu.reciprocal %97 {approx = true} : vector<8x1xf32> -> vector<8x1xf32>
    %99 = vector.broadcast %98 : vector<8x1xf32> to vector<8x8xf32>
    %100 = arith.mulf %95, %99 : vector<8x8xf32>
    %cst_34 = arith.constant dense<0.000000e+00> : vector<8x4xf32>
    %101 = tpu.matmul %100, %87, %cst_34 {dimension_numbers = #tpu.dot_dimension_numbers<[1], [0], [0], [1], [0, 0, 1, 1], [], []>} : vector<8x8xf32>, vector<8x4xf32>, vector<8x4xf32> -> vector<8x4xf32>
    %102 = vector.extract_strided_slice %14 {offsets = [0, 20], sizes = [8, 4], strides = [1, 1]} : vector<8x32xf32> to vector<8x4xf32>
    %103 = vector.extract_strided_slice %15 {offsets = [0, 20], sizes = [8, 4], strides = [1, 1]} : vector<8x32xf32> to vector<8x4xf32>
    %104 = vector.extract_strided_slice %16 {offsets = [0, 20], sizes = [8, 4], strides = [1, 1]} : vector<8x32xf32> to vector<8x4xf32>
    %cst_35 = arith.constant dense<0.000000e+00> : vector<8x8xf32>
    %105 = tpu.matmul %102, %103, %cst_35 {dimension_numbers = #tpu.dot_dimension_numbers<[1], [1], [0], [0], [0, 0, 1, 0], [], []>} : vector<8x4xf32>, vector<8x4xf32>, vector<8x8xf32> -> vector<8x8xf32>
    %cst_36 = arith.constant -1.000000e+09 : f32
    %106 = vector.broadcast %cst_36 : f32 to vector<8x8xf32>
    %107 = arith.select %11, %105, %106 : vector<8x8xi1>, vector<8x8xf32>
    %cst_37 = arith.constant dense<0xFF800000> : vector<8xf32>
    %108 = vector.multi_reduction <maximumf>, %107, %cst_37 [1] : vector<8x8xf32> to vector<8xf32>
    %109 = vector.shape_cast %108 : vector<8xf32> to vector<8x1xf32>
    %110 = vector.broadcast %109 : vector<8x1xf32> to vector<8x8xf32>
    %111 = arith.subf %107, %110 : vector<8x8xf32>
    %112 = math.exp %111 : vector<8x8xf32>
    %cst_38 = arith.constant dense<0.000000e+00> : vector<8xf32>
    %113 = vector.multi_reduction <add>, %112, %cst_38 [1] : vector<8x8xf32> to vector<8xf32>
    %114 = vector.shape_cast %113 : vector<8xf32> to vector<8x1xf32>
    %115 = tpu.reciprocal %114 {approx = true} : vector<8x1xf32> -> vector<8x1xf32>
    %116 = vector.broadcast %115 : vector<8x1xf32> to vector<8x8xf32>
    %117 = arith.mulf %112, %116 : vector<8x8xf32>
    %cst_39 = arith.constant dense<0.000000e+00> : vector<8x4xf32>
    %118 = tpu.matmul %117, %104, %cst_39 {dimension_numbers = #tpu.dot_dimension_numbers<[1], [0], [0], [1], [0, 0, 1, 1], [], []>} : vector<8x8xf32>, vector<8x4xf32>, vector<8x4xf32> -> vector<8x4xf32>
    %119 = vector.extract_strided_slice %14 {offsets = [0, 24], sizes = [8, 4], strides = [1, 1]} : vector<8x32xf32> to vector<8x4xf32>
    %120 = vector.extract_strided_slice %15 {offsets = [0, 24], sizes = [8, 4], strides = [1, 1]} : vector<8x32xf32> to vector<8x4xf32>
    %121 = vector.extract_strided_slice %16 {offsets = [0, 24], sizes = [8, 4], strides = [1, 1]} : vector<8x32xf32> to vector<8x4xf32>
    %cst_40 = arith.constant dense<0.000000e+00> : vector<8x8xf32>
    %122 = tpu.matmul %119, %120, %cst_40 {dimension_numbers = #tpu.dot_dimension_numbers<[1], [1], [0], [0], [0, 0, 1, 0], [], []>} : vector<8x4xf32>, vector<8x4xf32>, vector<8x8xf32> -> vector<8x8xf32>
    %cst_41 = arith.constant -1.000000e+09 : f32
    %123 = vector.broadcast %cst_41 : f32 to vector<8x8xf32>
    %124 = arith.select %11, %122, %123 : vector<8x8xi1>, vector<8x8xf32>
    %cst_42 = arith.constant dense<0xFF800000> : vector<8xf32>
    %125 = vector.multi_reduction <maximumf>, %124, %cst_42 [1] : vector<8x8xf32> to vector<8xf32>
    %126 = vector.shape_cast %125 : vector<8xf32> to vector<8x1xf32>
    %127 = vector.broadcast %126 : vector<8x1xf32> to vector<8x8xf32>
    %128 = arith.subf %124, %127 : vector<8x8xf32>
    %129 = math.exp %128 : vector<8x8xf32>
    %cst_43 = arith.constant dense<0.000000e+00> : vector<8xf32>
    %130 = vector.multi_reduction <add>, %129, %cst_43 [1] : vector<8x8xf32> to vector<8xf32>
    %131 = vector.shape_cast %130 : vector<8xf32> to vector<8x1xf32>
    %132 = tpu.reciprocal %131 {approx = true} : vector<8x1xf32> -> vector<8x1xf32>
    %133 = vector.broadcast %132 : vector<8x1xf32> to vector<8x8xf32>
    %134 = arith.mulf %129, %133 : vector<8x8xf32>
    %cst_44 = arith.constant dense<0.000000e+00> : vector<8x4xf32>
    %135 = tpu.matmul %134, %121, %cst_44 {dimension_numbers = #tpu.dot_dimension_numbers<[1], [0], [0], [1], [0, 0, 1, 1], [], []>} : vector<8x8xf32>, vector<8x4xf32>, vector<8x4xf32> -> vector<8x4xf32>
    %136 = vector.extract_strided_slice %14 {offsets = [0, 28], sizes = [8, 4], strides = [1, 1]} : vector<8x32xf32> to vector<8x4xf32>
    %137 = vector.extract_strided_slice %15 {offsets = [0, 28], sizes = [8, 4], strides = [1, 1]} : vector<8x32xf32> to vector<8x4xf32>
    %138 = vector.extract_strided_slice %16 {offsets = [0, 28], sizes = [8, 4], strides = [1, 1]} : vector<8x32xf32> to vector<8x4xf32>
    %cst_45 = arith.constant dense<0.000000e+00> : vector<8x8xf32>
    %139 = tpu.matmul %136, %137, %cst_45 {dimension_numbers = #tpu.dot_dimension_numbers<[1], [1], [0], [0], [0, 0, 1, 0], [], []>} : vector<8x4xf32>, vector<8x4xf32>, vector<8x8xf32> -> vector<8x8xf32>
    %cst_46 = arith.constant -1.000000e+09 : f32
    %140 = vector.broadcast %cst_46 : f32 to vector<8x8xf32>
    %141 = arith.select %11, %139, %140 : vector<8x8xi1>, vector<8x8xf32>
    %cst_47 = arith.constant dense<0xFF800000> : vector<8xf32>
    %142 = vector.multi_reduction <maximumf>, %141, %cst_47 [1] : vector<8x8xf32> to vector<8xf32>
    %143 = vector.shape_cast %142 : vector<8xf32> to vector<8x1xf32>
    %144 = vector.broadcast %143 : vector<8x1xf32> to vector<8x8xf32>
    %145 = arith.subf %141, %144 : vector<8x8xf32>
    %146 = math.exp %145 : vector<8x8xf32>
    %cst_48 = arith.constant dense<0.000000e+00> : vector<8xf32>
    %147 = vector.multi_reduction <add>, %146, %cst_48 [1] : vector<8x8xf32> to vector<8xf32>
    %148 = vector.shape_cast %147 : vector<8xf32> to vector<8x1xf32>
    %149 = tpu.reciprocal %148 {approx = true} : vector<8x1xf32> -> vector<8x1xf32>
    %150 = vector.broadcast %149 : vector<8x1xf32> to vector<8x8xf32>
    %151 = arith.mulf %146, %150 : vector<8x8xf32>
    %cst_49 = arith.constant dense<0.000000e+00> : vector<8x4xf32>
    %152 = tpu.matmul %151, %138, %cst_49 {dimension_numbers = #tpu.dot_dimension_numbers<[1], [0], [0], [1], [0, 0, 1, 1], [], []>} : vector<8x8xf32>, vector<8x4xf32>, vector<8x4xf32> -> vector<8x4xf32>
    %153 = tpu.concatenate %33, %50, %67, %84, %101, %118, %135, %152 in 1 : vector<8x4xf32>, vector<8x4xf32>, vector<8x4xf32>, vector<8x4xf32>, vector<8x4xf32>, vector<8x4xf32>, vector<8x4xf32>, vector<8x4xf32> -> vector<8x32xf32>
    %c0_50 = arith.constant 0 : index
    %c0_51 = arith.constant 0 : index
    %154 = vector.load %arg5[%c0_50, %c0_51] : memref<32x32xf32, #tpu.memory_space<vmem>>, vector<32x32xf32>
    %cst_52 = arith.constant dense<0.000000e+00> : vector<8x32xf32>
    %155 = tpu.matmul %153, %154, %cst_52 {dimension_numbers = #tpu.dot_dimension_numbers<[1], [0], [0], [1], [0, 0, 1, 1], [], []>} : vector<8x32xf32>, vector<32x32xf32>, vector<8x32xf32> -> vector<8x32xf32>
    %c0_53 = arith.constant 0 : index
    %c0_54 = arith.constant 0 : index
    %156 = vector.load %arg6[%c0_53, %c0_54] : memref<1x32xf32, #tpu.memory_space<vmem>>, vector<1x32xf32>
    %157 = vector.broadcast %156 : vector<1x32xf32> to vector<8x32xf32>
    %158 = arith.addf %155, %157 : vector<8x32xf32>
    %c0_55 = arith.constant 0 : index
    %c0_56 = arith.constant 0 : index
    %159 = vector.load %arg13[%c0_55, %c0_56] : memref<6x32xf32, #tpu.memory_space<vmem>>, vector<1x32xf32>
    %c1 = arith.constant 1 : index
    %c0_57 = arith.constant 0 : index
    %160 = vector.load %arg13[%c1, %c0_57] : memref<6x32xf32, #tpu.memory_space<vmem>>, vector<1x32xf32>
    %161 = arith.addf %158, %1 : vector<8x32xf32>
    %cst_58 = arith.constant dense<0.000000e+00> : vector<8xf32>
    %162 = vector.multi_reduction <add>, %161, %cst_58 [1] : vector<8x32xf32> to vector<8xf32>
    %163 = vector.shape_cast %162 : vector<8xf32> to vector<8x1xf32>
    %cst_59 = arith.constant 3.200000e+01 : f32
    %164 = vector.broadcast %cst_59 : f32 to vector<8x1xf32>
    %165 = arith.divf %163, %164 : vector<8x1xf32>
    %166 = vector.broadcast %165 : vector<8x1xf32> to vector<8x32xf32>
    %167 = arith.subf %161, %166 : vector<8x32xf32>
    %168 = arith.mulf %167, %167 : vector<8x32xf32>
    %cst_60 = arith.constant dense<0.000000e+00> : vector<8xf32>
    %169 = vector.multi_reduction <add>, %168, %cst_60 [1] : vector<8x32xf32> to vector<8xf32>
    %170 = vector.shape_cast %169 : vector<8xf32> to vector<8x1xf32>
    %cst_61 = arith.constant 0.0322580636 : f32
    %171 = vector.broadcast %cst_61 : f32 to vector<8x1xf32>
    %172 = arith.mulf %170, %171 : vector<8x1xf32>
    %173 = math.sqrt %172 : vector<8x1xf32>
    %cst_62 = arith.constant 9.99999997E-7 : f32
    %174 = vector.broadcast %cst_62 : f32 to vector<8x1xf32>
    %175 = arith.addf %173, %174 : vector<8x1xf32>
    %176 = tpu.reciprocal %175 {approx = true} : vector<8x1xf32> -> vector<8x1xf32>
    %177 = vector.broadcast %165 : vector<8x1xf32> to vector<8x32xf32>
    %178 = arith.subf %161, %177 : vector<8x32xf32>
    %179 = vector.broadcast %159 : vector<1x32xf32> to vector<8x32xf32>
    %180 = arith.mulf %179, %178 : vector<8x32xf32>
    %181 = vector.broadcast %176 : vector<8x1xf32> to vector<8x32xf32>
    %182 = arith.mulf %180, %181 : vector<8x32xf32>
    %183 = vector.broadcast %160 : vector<1x32xf32> to vector<8x32xf32>
    %184 = arith.addf %182, %183 : vector<8x32xf32>
    %c0_63 = arith.constant 0 : index
    %c0_64 = arith.constant 0 : index
    %185 = vector.load %arg7[%c0_63, %c0_64] : memref<32x32xf32, #tpu.memory_space<vmem>>, vector<32x32xf32>
    %cst_65 = arith.constant dense<0.000000e+00> : vector<8x32xf32>
    %186 = tpu.matmul %184, %185, %cst_65 {dimension_numbers = #tpu.dot_dimension_numbers<[1], [0], [0], [1], [0, 0, 1, 1], [], []>} : vector<8x32xf32>, vector<32x32xf32>, vector<8x32xf32> -> vector<8x32xf32>
    %c0_66 = arith.constant 0 : index
    %c0_67 = arith.constant 0 : index
    %187 = vector.load %arg8[%c0_66, %c0_67] : memref<1x32xf32, #tpu.memory_space<vmem>>, vector<1x32xf32>
    %188 = vector.broadcast %187 : vector<1x32xf32> to vector<8x32xf32>
    %189 = arith.addf %186, %188 : vector<8x32xf32>
    %c0_68 = arith.constant 0 : index
    %c0_69 = arith.constant 0 : index
    %190 = vector.load %arg9[%c0_68, %c0_69] : memref<32x64xf32, #tpu.memory_space<vmem>>, vector<32x64xf32>
    %cst_70 = arith.constant dense<0.000000e+00> : vector<10x64xf32>
    %191 = tpu.matmul %3, %190, %cst_70 {dimension_numbers = #tpu.dot_dimension_numbers<[1], [0], [0], [1], [0, 0, 1, 1], [], []>} : vector<10x32xf32>, vector<32x64xf32>, vector<10x64xf32> -> vector<10x64xf32>
    %c0_71 = arith.constant 0 : index
    %c0_72 = arith.constant 0 : index
    %192 = vector.load %arg10[%c0_71, %c0_72] : memref<1x64xf32, #tpu.memory_space<vmem>>, vector<1x64xf32>
    %193 = vector.broadcast %192 : vector<1x64xf32> to vector<10x64xf32>
    %194 = arith.addf %191, %193 : vector<10x64xf32>
    %cst_73 = arith.constant 5.000000e-01 : f32
    %195 = vector.broadcast %cst_73 : f32 to vector<8x32xf32>
    %196 = arith.mulf %189, %195 : vector<8x32xf32>
    %197 = vector.extract_strided_slice %194 {offsets = [0, 0], sizes = [10, 32], strides = [1, 1]} : vector<10x64xf32> to vector<10x32xf32>
    %198 = vector.extract_strided_slice %194 {offsets = [0, 32], sizes = [10, 32], strides = [1, 1]} : vector<10x64xf32> to vector<10x32xf32>
    %199 = vector.extract_strided_slice %196 {offsets = [0, 0], sizes = [8, 4], strides = [1, 1]} : vector<8x32xf32> to vector<8x4xf32>
    %200 = vector.extract_strided_slice %197 {offsets = [0, 0], sizes = [10, 4], strides = [1, 1]} : vector<10x32xf32> to vector<10x4xf32>
    %201 = vector.extract_strided_slice %198 {offsets = [0, 0], sizes = [10, 4], strides = [1, 1]} : vector<10x32xf32> to vector<10x4xf32>
    %cst_74 = arith.constant dense<0.000000e+00> : vector<8x10xf32>
    %202 = tpu.matmul %199, %200, %cst_74 {dimension_numbers = #tpu.dot_dimension_numbers<[1], [1], [0], [0], [0, 0, 1, 0], [], []>} : vector<8x4xf32>, vector<10x4xf32>, vector<8x10xf32> -> vector<8x10xf32>
    %cst_75 = arith.constant dense<0xFF800000> : vector<8xf32>
    %203 = vector.multi_reduction <maximumf>, %202, %cst_75 [1] : vector<8x10xf32> to vector<8xf32>
    %204 = vector.shape_cast %203 : vector<8xf32> to vector<8x1xf32>
    %205 = vector.broadcast %204 : vector<8x1xf32> to vector<8x10xf32>
    %206 = arith.subf %202, %205 : vector<8x10xf32>
    %207 = math.exp %206 : vector<8x10xf32>
    %cst_76 = arith.constant dense<0.000000e+00> : vector<8xf32>
    %208 = vector.multi_reduction <add>, %207, %cst_76 [1] : vector<8x10xf32> to vector<8xf32>
    %209 = vector.shape_cast %208 : vector<8xf32> to vector<8x1xf32>
    %210 = tpu.reciprocal %209 {approx = true} : vector<8x1xf32> -> vector<8x1xf32>
    %211 = vector.broadcast %210 : vector<8x1xf32> to vector<8x10xf32>
    %212 = arith.mulf %207, %211 : vector<8x10xf32>
    %cst_77 = arith.constant dense<0.000000e+00> : vector<8x4xf32>
    %213 = tpu.matmul %212, %201, %cst_77 {dimension_numbers = #tpu.dot_dimension_numbers<[1], [0], [0], [1], [0, 0, 1, 1], [], []>} : vector<8x10xf32>, vector<10x4xf32>, vector<8x4xf32> -> vector<8x4xf32>
    %214 = vector.extract_strided_slice %196 {offsets = [0, 4], sizes = [8, 4], strides = [1, 1]} : vector<8x32xf32> to vector<8x4xf32>
    %215 = vector.extract_strided_slice %197 {offsets = [0, 4], sizes = [10, 4], strides = [1, 1]} : vector<10x32xf32> to vector<10x4xf32>
    %216 = vector.extract_strided_slice %198 {offsets = [0, 4], sizes = [10, 4], strides = [1, 1]} : vector<10x32xf32> to vector<10x4xf32>
    %cst_78 = arith.constant dense<0.000000e+00> : vector<8x10xf32>
    %217 = tpu.matmul %214, %215, %cst_78 {dimension_numbers = #tpu.dot_dimension_numbers<[1], [1], [0], [0], [0, 0, 1, 0], [], []>} : vector<8x4xf32>, vector<10x4xf32>, vector<8x10xf32> -> vector<8x10xf32>
    %cst_79 = arith.constant dense<0xFF800000> : vector<8xf32>
    %218 = vector.multi_reduction <maximumf>, %217, %cst_79 [1] : vector<8x10xf32> to vector<8xf32>
    %219 = vector.shape_cast %218 : vector<8xf32> to vector<8x1xf32>
    %220 = vector.broadcast %219 : vector<8x1xf32> to vector<8x10xf32>
    %221 = arith.subf %217, %220 : vector<8x10xf32>
    %222 = math.exp %221 : vector<8x10xf32>
    %cst_80 = arith.constant dense<0.000000e+00> : vector<8xf32>
    %223 = vector.multi_reduction <add>, %222, %cst_80 [1] : vector<8x10xf32> to vector<8xf32>
    %224 = vector.shape_cast %223 : vector<8xf32> to vector<8x1xf32>
    %225 = tpu.reciprocal %224 {approx = true} : vector<8x1xf32> -> vector<8x1xf32>
    %226 = vector.broadcast %225 : vector<8x1xf32> to vector<8x10xf32>
    %227 = arith.mulf %222, %226 : vector<8x10xf32>
    %cst_81 = arith.constant dense<0.000000e+00> : vector<8x4xf32>
    %228 = tpu.matmul %227, %216, %cst_81 {dimension_numbers = #tpu.dot_dimension_numbers<[1], [0], [0], [1], [0, 0, 1, 1], [], []>} : vector<8x10xf32>, vector<10x4xf32>, vector<8x4xf32> -> vector<8x4xf32>
    %229 = vector.extract_strided_slice %196 {offsets = [0, 8], sizes = [8, 4], strides = [1, 1]} : vector<8x32xf32> to vector<8x4xf32>
    %230 = vector.extract_strided_slice %197 {offsets = [0, 8], sizes = [10, 4], strides = [1, 1]} : vector<10x32xf32> to vector<10x4xf32>
    %231 = vector.extract_strided_slice %198 {offsets = [0, 8], sizes = [10, 4], strides = [1, 1]} : vector<10x32xf32> to vector<10x4xf32>
    %cst_82 = arith.constant dense<0.000000e+00> : vector<8x10xf32>
    %232 = tpu.matmul %229, %230, %cst_82 {dimension_numbers = #tpu.dot_dimension_numbers<[1], [1], [0], [0], [0, 0, 1, 0], [], []>} : vector<8x4xf32>, vector<10x4xf32>, vector<8x10xf32> -> vector<8x10xf32>
    %cst_83 = arith.constant dense<0xFF800000> : vector<8xf32>
    %233 = vector.multi_reduction <maximumf>, %232, %cst_83 [1] : vector<8x10xf32> to vector<8xf32>
    %234 = vector.shape_cast %233 : vector<8xf32> to vector<8x1xf32>
    %235 = vector.broadcast %234 : vector<8x1xf32> to vector<8x10xf32>
    %236 = arith.subf %232, %235 : vector<8x10xf32>
    %237 = math.exp %236 : vector<8x10xf32>
    %cst_84 = arith.constant dense<0.000000e+00> : vector<8xf32>
    %238 = vector.multi_reduction <add>, %237, %cst_84 [1] : vector<8x10xf32> to vector<8xf32>
    %239 = vector.shape_cast %238 : vector<8xf32> to vector<8x1xf32>
    %240 = tpu.reciprocal %239 {approx = true} : vector<8x1xf32> -> vector<8x1xf32>
    %241 = vector.broadcast %240 : vector<8x1xf32> to vector<8x10xf32>
    %242 = arith.mulf %237, %241 : vector<8x10xf32>
    %cst_85 = arith.constant dense<0.000000e+00> : vector<8x4xf32>
    %243 = tpu.matmul %242, %231, %cst_85 {dimension_numbers = #tpu.dot_dimension_numbers<[1], [0], [0], [1], [0, 0, 1, 1], [], []>} : vector<8x10xf32>, vector<10x4xf32>, vector<8x4xf32> -> vector<8x4xf32>
    %244 = vector.extract_strided_slice %196 {offsets = [0, 12], sizes = [8, 4], strides = [1, 1]} : vector<8x32xf32> to vector<8x4xf32>
    %245 = vector.extract_strided_slice %197 {offsets = [0, 12], sizes = [10, 4], strides = [1, 1]} : vector<10x32xf32> to vector<10x4xf32>
    %246 = vector.extract_strided_slice %198 {offsets = [0, 12], sizes = [10, 4], strides = [1, 1]} : vector<10x32xf32> to vector<10x4xf32>
    %cst_86 = arith.constant dense<0.000000e+00> : vector<8x10xf32>
    %247 = tpu.matmul %244, %245, %cst_86 {dimension_numbers = #tpu.dot_dimension_numbers<[1], [1], [0], [0], [0, 0, 1, 0], [], []>} : vector<8x4xf32>, vector<10x4xf32>, vector<8x10xf32> -> vector<8x10xf32>
    %cst_87 = arith.constant dense<0xFF800000> : vector<8xf32>
    %248 = vector.multi_reduction <maximumf>, %247, %cst_87 [1] : vector<8x10xf32> to vector<8xf32>
    %249 = vector.shape_cast %248 : vector<8xf32> to vector<8x1xf32>
    %250 = vector.broadcast %249 : vector<8x1xf32> to vector<8x10xf32>
    %251 = arith.subf %247, %250 : vector<8x10xf32>
    %252 = math.exp %251 : vector<8x10xf32>
    %cst_88 = arith.constant dense<0.000000e+00> : vector<8xf32>
    %253 = vector.multi_reduction <add>, %252, %cst_88 [1] : vector<8x10xf32> to vector<8xf32>
    %254 = vector.shape_cast %253 : vector<8xf32> to vector<8x1xf32>
    %255 = tpu.reciprocal %254 {approx = true} : vector<8x1xf32> -> vector<8x1xf32>
    %256 = vector.broadcast %255 : vector<8x1xf32> to vector<8x10xf32>
    %257 = arith.mulf %252, %256 : vector<8x10xf32>
    %cst_89 = arith.constant dense<0.000000e+00> : vector<8x4xf32>
    %258 = tpu.matmul %257, %246, %cst_89 {dimension_numbers = #tpu.dot_dimension_numbers<[1], [0], [0], [1], [0, 0, 1, 1], [], []>} : vector<8x10xf32>, vector<10x4xf32>, vector<8x4xf32> -> vector<8x4xf32>
    %259 = vector.extract_strided_slice %196 {offsets = [0, 16], sizes = [8, 4], strides = [1, 1]} : vector<8x32xf32> to vector<8x4xf32>
    %260 = vector.extract_strided_slice %197 {offsets = [0, 16], sizes = [10, 4], strides = [1, 1]} : vector<10x32xf32> to vector<10x4xf32>
    %261 = vector.extract_strided_slice %198 {offsets = [0, 16], sizes = [10, 4], strides = [1, 1]} : vector<10x32xf32> to vector<10x4xf32>
    %cst_90 = arith.constant dense<0.000000e+00> : vector<8x10xf32>
    %262 = tpu.matmul %259, %260, %cst_90 {dimension_numbers = #tpu.dot_dimension_numbers<[1], [1], [0], [0], [0, 0, 1, 0], [], []>} : vector<8x4xf32>, vector<10x4xf32>, vector<8x10xf32> -> vector<8x10xf32>
    %cst_91 = arith.constant dense<0xFF800000> : vector<8xf32>
    %263 = vector.multi_reduction <maximumf>, %262, %cst_91 [1] : vector<8x10xf32> to vector<8xf32>
    %264 = vector.shape_cast %263 : vector<8xf32> to vector<8x1xf32>
    %265 = vector.broadcast %264 : vector<8x1xf32> to vector<8x10xf32>
    %266 = arith.subf %262, %265 : vector<8x10xf32>
    %267 = math.exp %266 : vector<8x10xf32>
    %cst_92 = arith.constant dense<0.000000e+00> : vector<8xf32>
    %268 = vector.multi_reduction <add>, %267, %cst_92 [1] : vector<8x10xf32> to vector<8xf32>
    %269 = vector.shape_cast %268 : vector<8xf32> to vector<8x1xf32>
    %270 = tpu.reciprocal %269 {approx = true} : vector<8x1xf32> -> vector<8x1xf32>
    %271 = vector.broadcast %270 : vector<8x1xf32> to vector<8x10xf32>
    %272 = arith.mulf %267, %271 : vector<8x10xf32>
    %cst_93 = arith.constant dense<0.000000e+00> : vector<8x4xf32>
    %273 = tpu.matmul %272, %261, %cst_93 {dimension_numbers = #tpu.dot_dimension_numbers<[1], [0], [0], [1], [0, 0, 1, 1], [], []>} : vector<8x10xf32>, vector<10x4xf32>, vector<8x4xf32> -> vector<8x4xf32>
    %274 = vector.extract_strided_slice %196 {offsets = [0, 20], sizes = [8, 4], strides = [1, 1]} : vector<8x32xf32> to vector<8x4xf32>
    %275 = vector.extract_strided_slice %197 {offsets = [0, 20], sizes = [10, 4], strides = [1, 1]} : vector<10x32xf32> to vector<10x4xf32>
    %276 = vector.extract_strided_slice %198 {offsets = [0, 20], sizes = [10, 4], strides = [1, 1]} : vector<10x32xf32> to vector<10x4xf32>
    %cst_94 = arith.constant dense<0.000000e+00> : vector<8x10xf32>
    %277 = tpu.matmul %274, %275, %cst_94 {dimension_numbers = #tpu.dot_dimension_numbers<[1], [1], [0], [0], [0, 0, 1, 0], [], []>} : vector<8x4xf32>, vector<10x4xf32>, vector<8x10xf32> -> vector<8x10xf32>
    %cst_95 = arith.constant dense<0xFF800000> : vector<8xf32>
    %278 = vector.multi_reduction <maximumf>, %277, %cst_95 [1] : vector<8x10xf32> to vector<8xf32>
    %279 = vector.shape_cast %278 : vector<8xf32> to vector<8x1xf32>
    %280 = vector.broadcast %279 : vector<8x1xf32> to vector<8x10xf32>
    %281 = arith.subf %277, %280 : vector<8x10xf32>
    %282 = math.exp %281 : vector<8x10xf32>
    %cst_96 = arith.constant dense<0.000000e+00> : vector<8xf32>
    %283 = vector.multi_reduction <add>, %282, %cst_96 [1] : vector<8x10xf32> to vector<8xf32>
    %284 = vector.shape_cast %283 : vector<8xf32> to vector<8x1xf32>
    %285 = tpu.reciprocal %284 {approx = true} : vector<8x1xf32> -> vector<8x1xf32>
    %286 = vector.broadcast %285 : vector<8x1xf32> to vector<8x10xf32>
    %287 = arith.mulf %282, %286 : vector<8x10xf32>
    %cst_97 = arith.constant dense<0.000000e+00> : vector<8x4xf32>
    %288 = tpu.matmul %287, %276, %cst_97 {dimension_numbers = #tpu.dot_dimension_numbers<[1], [0], [0], [1], [0, 0, 1, 1], [], []>} : vector<8x10xf32>, vector<10x4xf32>, vector<8x4xf32> -> vector<8x4xf32>
    %289 = vector.extract_strided_slice %196 {offsets = [0, 24], sizes = [8, 4], strides = [1, 1]} : vector<8x32xf32> to vector<8x4xf32>
    %290 = vector.extract_strided_slice %197 {offsets = [0, 24], sizes = [10, 4], strides = [1, 1]} : vector<10x32xf32> to vector<10x4xf32>
    %291 = vector.extract_strided_slice %198 {offsets = [0, 24], sizes = [10, 4], strides = [1, 1]} : vector<10x32xf32> to vector<10x4xf32>
    %cst_98 = arith.constant dense<0.000000e+00> : vector<8x10xf32>
    %292 = tpu.matmul %289, %290, %cst_98 {dimension_numbers = #tpu.dot_dimension_numbers<[1], [1], [0], [0], [0, 0, 1, 0], [], []>} : vector<8x4xf32>, vector<10x4xf32>, vector<8x10xf32> -> vector<8x10xf32>
    %cst_99 = arith.constant dense<0xFF800000> : vector<8xf32>
    %293 = vector.multi_reduction <maximumf>, %292, %cst_99 [1] : vector<8x10xf32> to vector<8xf32>
    %294 = vector.shape_cast %293 : vector<8xf32> to vector<8x1xf32>
    %295 = vector.broadcast %294 : vector<8x1xf32> to vector<8x10xf32>
    %296 = arith.subf %292, %295 : vector<8x10xf32>
    %297 = math.exp %296 : vector<8x10xf32>
    %cst_100 = arith.constant dense<0.000000e+00> : vector<8xf32>
    %298 = vector.multi_reduction <add>, %297, %cst_100 [1] : vector<8x10xf32> to vector<8xf32>
    %299 = vector.shape_cast %298 : vector<8xf32> to vector<8x1xf32>
    %300 = tpu.reciprocal %299 {approx = true} : vector<8x1xf32> -> vector<8x1xf32>
    %301 = vector.broadcast %300 : vector<8x1xf32> to vector<8x10xf32>
    %302 = arith.mulf %297, %301 : vector<8x10xf32>
    %cst_101 = arith.constant dense<0.000000e+00> : vector<8x4xf32>
    %303 = tpu.matmul %302, %291, %cst_101 {dimension_numbers = #tpu.dot_dimension_numbers<[1], [0], [0], [1], [0, 0, 1, 1], [], []>} : vector<8x10xf32>, vector<10x4xf32>, vector<8x4xf32> -> vector<8x4xf32>
    %304 = vector.extract_strided_slice %196 {offsets = [0, 28], sizes = [8, 4], strides = [1, 1]} : vector<8x32xf32> to vector<8x4xf32>
    %305 = vector.extract_strided_slice %197 {offsets = [0, 28], sizes = [10, 4], strides = [1, 1]} : vector<10x32xf32> to vector<10x4xf32>
    %306 = vector.extract_strided_slice %198 {offsets = [0, 28], sizes = [10, 4], strides = [1, 1]} : vector<10x32xf32> to vector<10x4xf32>
    %cst_102 = arith.constant dense<0.000000e+00> : vector<8x10xf32>
    %307 = tpu.matmul %304, %305, %cst_102 {dimension_numbers = #tpu.dot_dimension_numbers<[1], [1], [0], [0], [0, 0, 1, 0], [], []>} : vector<8x4xf32>, vector<10x4xf32>, vector<8x10xf32> -> vector<8x10xf32>
    %cst_103 = arith.constant dense<0xFF800000> : vector<8xf32>
    %308 = vector.multi_reduction <maximumf>, %307, %cst_103 [1] : vector<8x10xf32> to vector<8xf32>
    %309 = vector.shape_cast %308 : vector<8xf32> to vector<8x1xf32>
    %310 = vector.broadcast %309 : vector<8x1xf32> to vector<8x10xf32>
    %311 = arith.subf %307, %310 : vector<8x10xf32>
    %312 = math.exp %311 : vector<8x10xf32>
    %cst_104 = arith.constant dense<0.000000e+00> : vector<8xf32>
    %313 = vector.multi_reduction <add>, %312, %cst_104 [1] : vector<8x10xf32> to vector<8xf32>
    %314 = vector.shape_cast %313 : vector<8xf32> to vector<8x1xf32>
    %315 = tpu.reciprocal %314 {approx = true} : vector<8x1xf32> -> vector<8x1xf32>
    %316 = vector.broadcast %315 : vector<8x1xf32> to vector<8x10xf32>
    %317 = arith.mulf %312, %316 : vector<8x10xf32>
    %cst_105 = arith.constant dense<0.000000e+00> : vector<8x4xf32>
    %318 = tpu.matmul %317, %306, %cst_105 {dimension_numbers = #tpu.dot_dimension_numbers<[1], [0], [0], [1], [0, 0, 1, 1], [], []>} : vector<8x10xf32>, vector<10x4xf32>, vector<8x4xf32> -> vector<8x4xf32>
    %319 = tpu.concatenate %213, %228, %243, %258, %273, %288, %303, %318 in 1 : vector<8x4xf32>, vector<8x4xf32>, vector<8x4xf32>, vector<8x4xf32>, vector<8x4xf32>, vector<8x4xf32>, vector<8x4xf32>, vector<8x4xf32> -> vector<8x32xf32>
    %c0_106 = arith.constant 0 : index
    %c0_107 = arith.constant 0 : index
    %320 = vector.load %arg11[%c0_106, %c0_107] : memref<32x32xf32, #tpu.memory_space<vmem>>, vector<32x32xf32>
    %cst_108 = arith.constant dense<0.000000e+00> : vector<8x32xf32>
    %321 = tpu.matmul %319, %320, %cst_108 {dimension_numbers = #tpu.dot_dimension_numbers<[1], [0], [0], [1], [0, 0, 1, 1], [], []>} : vector<8x32xf32>, vector<32x32xf32>, vector<8x32xf32> -> vector<8x32xf32>
    %c0_109 = arith.constant 0 : index
    %c0_110 = arith.constant 0 : index
    %322 = vector.load %arg12[%c0_109, %c0_110] : memref<1x32xf32, #tpu.memory_space<vmem>>, vector<1x32xf32>
    %323 = vector.broadcast %322 : vector<1x32xf32> to vector<8x32xf32>
    %324 = arith.addf %321, %323 : vector<8x32xf32>
    %c2 = arith.constant 2 : index
    %c0_111 = arith.constant 0 : index
    %325 = vector.load %arg13[%c2, %c0_111] : memref<6x32xf32, #tpu.memory_space<vmem>>, vector<1x32xf32>
    %c3 = arith.constant 3 : index
    %c0_112 = arith.constant 0 : index
    %326 = vector.load %arg13[%c3, %c0_112] : memref<6x32xf32, #tpu.memory_space<vmem>>, vector<1x32xf32>
    %327 = arith.addf %324, %184 : vector<8x32xf32>
    %cst_113 = arith.constant dense<0.000000e+00> : vector<8xf32>
    %328 = vector.multi_reduction <add>, %327, %cst_113 [1] : vector<8x32xf32> to vector<8xf32>
    %329 = vector.shape_cast %328 : vector<8xf32> to vector<8x1xf32>
    %cst_114 = arith.constant 3.200000e+01 : f32
    %330 = vector.broadcast %cst_114 : f32 to vector<8x1xf32>
    %331 = arith.divf %329, %330 : vector<8x1xf32>
    %332 = vector.broadcast %331 : vector<8x1xf32> to vector<8x32xf32>
    %333 = arith.subf %327, %332 : vector<8x32xf32>
    %334 = arith.mulf %333, %333 : vector<8x32xf32>
    %cst_115 = arith.constant dense<0.000000e+00> : vector<8xf32>
    %335 = vector.multi_reduction <add>, %334, %cst_115 [1] : vector<8x32xf32> to vector<8xf32>
    %336 = vector.shape_cast %335 : vector<8xf32> to vector<8x1xf32>
    %cst_116 = arith.constant 0.0322580636 : f32
    %337 = vector.broadcast %cst_116 : f32 to vector<8x1xf32>
    %338 = arith.mulf %336, %337 : vector<8x1xf32>
    %339 = math.sqrt %338 : vector<8x1xf32>
    %cst_117 = arith.constant 9.99999997E-7 : f32
    %340 = vector.broadcast %cst_117 : f32 to vector<8x1xf32>
    %341 = arith.addf %339, %340 : vector<8x1xf32>
    %342 = tpu.reciprocal %341 {approx = true} : vector<8x1xf32> -> vector<8x1xf32>
    %343 = vector.broadcast %331 : vector<8x1xf32> to vector<8x32xf32>
    %344 = arith.subf %327, %343 : vector<8x32xf32>
    %345 = vector.broadcast %325 : vector<1x32xf32> to vector<8x32xf32>
    %346 = arith.mulf %345, %344 : vector<8x32xf32>
    %347 = vector.broadcast %342 : vector<8x1xf32> to vector<8x32xf32>
    %348 = arith.mulf %346, %347 : vector<8x32xf32>
    %349 = vector.broadcast %326 : vector<1x32xf32> to vector<8x32xf32>
    %350 = arith.addf %348, %349 : vector<8x32xf32>
    %c0_118 = arith.constant 0 : index
    %c0_119 = arith.constant 0 : index
    %351 = vector.load %arg14[%c0_118, %c0_119] : memref<32x64xf32, #tpu.memory_space<vmem>>, vector<32x64xf32>
    %cst_120 = arith.constant dense<0.000000e+00> : vector<8x64xf32>
    %352 = tpu.matmul %350, %351, %cst_120 {dimension_numbers = #tpu.dot_dimension_numbers<[1], [0], [0], [1], [0, 0, 1, 1], [], []>} : vector<8x32xf32>, vector<32x64xf32>, vector<8x64xf32> -> vector<8x64xf32>
    %c0_121 = arith.constant 0 : index
    %c0_122 = arith.constant 0 : index
    %353 = vector.load %arg15[%c0_121, %c0_122] : memref<1x64xf32, #tpu.memory_space<vmem>>, vector<1x64xf32>
    %354 = vector.broadcast %353 : vector<1x64xf32> to vector<8x64xf32>
    %355 = arith.addf %352, %354 : vector<8x64xf32>
    %cst_123 = arith.constant 0.000000e+00 : f32
    %356 = vector.broadcast %cst_123 : f32 to vector<8x64xf32>
    %357 = arith.maximumf %355, %356 : vector<8x64xf32>
    %c0_124 = arith.constant 0 : index
    %c0_125 = arith.constant 0 : index
    %358 = vector.load %arg16[%c0_124, %c0_125] : memref<64x32xf32, #tpu.memory_space<vmem>>, vector<64x32xf32>
    %cst_126 = arith.constant dense<0.000000e+00> : vector<8x32xf32>
    %359 = tpu.matmul %357, %358, %cst_126 {dimension_numbers = #tpu.dot_dimension_numbers<[1], [0], [0], [1], [0, 0, 1, 1], [], []>} : vector<8x64xf32>, vector<64x32xf32>, vector<8x32xf32> -> vector<8x32xf32>
    %c0_127 = arith.constant 0 : index
    %c0_128 = arith.constant 0 : index
    %360 = vector.load %arg17[%c0_127, %c0_128] : memref<1x32xf32, #tpu.memory_space<vmem>>, vector<1x32xf32>
    %361 = vector.broadcast %360 : vector<1x32xf32> to vector<8x32xf32>
    %362 = arith.addf %359, %361 : vector<8x32xf32>
    %c4 = arith.constant 4 : index
    %c0_129 = arith.constant 0 : index
    %363 = vector.load %arg13[%c4, %c0_129] : memref<6x32xf32, #tpu.memory_space<vmem>>, vector<1x32xf32>
    %c5 = arith.constant 5 : index
    %c0_130 = arith.constant 0 : index
    %364 = vector.load %arg13[%c5, %c0_130] : memref<6x32xf32, #tpu.memory_space<vmem>>, vector<1x32xf32>
    %365 = arith.addf %362, %350 : vector<8x32xf32>
    %cst_131 = arith.constant dense<0.000000e+00> : vector<8xf32>
    %366 = vector.multi_reduction <add>, %365, %cst_131 [1] : vector<8x32xf32> to vector<8xf32>
    %367 = vector.shape_cast %366 : vector<8xf32> to vector<8x1xf32>
    %cst_132 = arith.constant 3.200000e+01 : f32
    %368 = vector.broadcast %cst_132 : f32 to vector<8x1xf32>
    %369 = arith.divf %367, %368 : vector<8x1xf32>
    %370 = vector.broadcast %369 : vector<8x1xf32> to vector<8x32xf32>
    %371 = arith.subf %365, %370 : vector<8x32xf32>
    %372 = arith.mulf %371, %371 : vector<8x32xf32>
    %cst_133 = arith.constant dense<0.000000e+00> : vector<8xf32>
    %373 = vector.multi_reduction <add>, %372, %cst_133 [1] : vector<8x32xf32> to vector<8xf32>
    %374 = vector.shape_cast %373 : vector<8xf32> to vector<8x1xf32>
    %cst_134 = arith.constant 0.0322580636 : f32
    %375 = vector.broadcast %cst_134 : f32 to vector<8x1xf32>
    %376 = arith.mulf %374, %375 : vector<8x1xf32>
    %377 = math.sqrt %376 : vector<8x1xf32>
    %cst_135 = arith.constant 9.99999997E-7 : f32
    %378 = vector.broadcast %cst_135 : f32 to vector<8x1xf32>
    %379 = arith.addf %377, %378 : vector<8x1xf32>
    %380 = tpu.reciprocal %379 {approx = true} : vector<8x1xf32> -> vector<8x1xf32>
    %381 = vector.broadcast %369 : vector<8x1xf32> to vector<8x32xf32>
    %382 = arith.subf %365, %381 : vector<8x32xf32>
    %383 = vector.broadcast %363 : vector<1x32xf32> to vector<8x32xf32>
    %384 = arith.mulf %383, %382 : vector<8x32xf32>
    %385 = vector.broadcast %380 : vector<8x1xf32> to vector<8x32xf32>
    %386 = arith.mulf %384, %385 : vector<8x32xf32>
    %387 = vector.broadcast %364 : vector<1x32xf32> to vector<8x32xf32>
    %388 = arith.addf %386, %387 : vector<8x32xf32>
    %c0_136 = arith.constant 0 : index
    %c0_137 = arith.constant 0 : index
    %c0_138 = arith.constant 0 : index
    %389 = vector.load %arg18[%c0_136, %c0_137, %c0_138] : memref<1x8x32xf32, #tpu.memory_space<vmem>>, vector<1x8x32xf32>
    %390 = vector.shape_cast %389 : vector<1x8x32xf32> to vector<8x32xf32>
    %391 = vector.shape_cast %388 : vector<8x32xf32> to vector<1x8x32xf32>
    tpu.vector_store %arg18[%c0_136, %c0_137, %c0_138], %391 {strides = array<i32>} : memref<1x8x32xf32, #tpu.memory_space<vmem>>, vector<1x8x32xf32>,
    return
  }
  func.func @transform_0(%arg0: i32) -> (i32, i32, i32) {
    %c0_i32 = arith.constant 0 : i32
    %c0_i32_0 = arith.constant 0 : i32
    %c0_i32_1 = arith.constant 0 : i32
    return %arg0, %c0_i32, %c0_i32_0 : i32, i32, i32
  }
  func.func @transform_1(%arg0: i32) -> (i32, i32, i32) {
    %c0_i32 = arith.constant 0 : i32
    %c0_i32_0 = arith.constant 0 : i32
    %c0_i32_1 = arith.constant 0 : i32
    return %arg0, %c0_i32, %c0_i32_0 : i32, i32, i32
  }
  func.func @transform_2(%arg0: i32) -> (i32, i32) {
    %c0_i32 = arith.constant 0 : i32
    %c0_i32_0 = arith.constant 0 : i32
    %c0_i32_1 = arith.constant 0 : i32
    return %c0_i32, %c0_i32_0 : i32, i32
  }
  func.func @transform_3(%arg0: i32) -> (i32, i32) {
    %c0_i32 = arith.constant 0 : i32
    %c0_i32_0 = arith.constant 0 : i32
    %c0_i32_1 = arith.constant 0 : i32
    return %c0_i32, %c0_i32_0 : i32, i32
  }
  func.func @transform_4(%arg0: i32) -> (i32, i32) {
    %c0_i32 = arith.constant 0 : i32
    %c0_i32_0 = arith.constant 0 : i32
    %c0_i32_1 = arith.constant 0 : i32
    return %c0_i32, %c0_i32_0 : i32, i32
  }
  func.func @transform_5(%arg0: i32) -> (i32, i32) {
    %c0_i32 = arith.constant 0 : i32
    %c0_i32_0 = arith.constant 0 : i32
    %c0_i32_1 = arith.constant 0 : i32
    return %c0_i32, %c0_i32_0 : i32, i32
  }
  func.func @transform_6(%arg0: i32) -> (i32, i32) {
    %c0_i32 = arith.constant 0 : i32
    %c0_i32_0 = arith.constant 0 : i32
    %c0_i32_1 = arith.constant 0 : i32
    return %c0_i32, %c0_i32_0 : i32, i32
  }
  func.func @transform_7(%arg0: i32) -> (i32, i32) {
    %c0_i32 = arith.constant 0 : i32
    %c0_i32_0 = arith.constant 0 : i32
    %c0_i32_1 = arith.constant 0 : i32
    return %c0_i32, %c0_i32_0 : i32, i32
  }
  func.func @transform_8(%arg0: i32) -> (i32, i32) {
    %c0_i32 = arith.constant 0 : i32
    %c0_i32_0 = arith.constant 0 : i32
    %c0_i32_1 = arith.constant 0 : i32
    return %c0_i32, %c0_i32_0 : i32, i32
  }
  func.func @transform_9(%arg0: i32) -> (i32, i32) {
    %c0_i32 = arith.constant 0 : i32
    %c0_i32_0 = arith.constant 0 : i32
    %c0_i32_1 = arith.constant 0 : i32
    return %c0_i32, %c0_i32_0 : i32, i32
  }
  func.func @transform_10(%arg0: i32) -> (i32, i32) {
    %c0_i32 = arith.constant 0 : i32
    %c0_i32_0 = arith.constant 0 : i32
    %c0_i32_1 = arith.constant 0 : i32
    return %c0_i32, %c0_i32_0 : i32, i32
  }
  func.func @transform_11(%arg0: i32) -> (i32, i32) {
    %c0_i32 = arith.constant 0 : i32
    %c0_i32_0 = arith.constant 0 : i32
    %c0_i32_1 = arith.constant 0 : i32
    return %c0_i32, %c0_i32_0 : i32, i32
  }
  func.func @transform_12(%arg0: i32) -> (i32, i32) {
    %c0_i32 = arith.constant 0 : i32
    %c0_i32_0 = arith.constant 0 : i32
    %c0_i32_1 = arith.constant 0 : i32
    return %c0_i32, %c0_i32_0 : i32, i32
  }
  func.func @transform_13(%arg0: i32) -> (i32, i32) {
    %c0_i32 = arith.constant 0 : i32
    %c0_i32_0 = arith.constant 0 : i32
    %c0_i32_1 = arith.constant 0 : i32
    return %c0_i32, %c0_i32_0 : i32, i32
  }
  func.func @transform_14(%arg0: i32) -> (i32, i32) {
    %c0_i32 = arith.constant 0 : i32
    %c0_i32_0 = arith.constant 0 : i32
    %c0_i32_1 = arith.constant 0 : i32
    return %c0_i32, %c0_i32_0 : i32, i32
  }
  func.func @transform_15(%arg0: i32) -> (i32, i32) {
    %c0_i32 = arith.constant 0 : i32
    %c0_i32_0 = arith.constant 0 : i32
    %c0_i32_1 = arith.constant 0 : i32
    return %c0_i32, %c0_i32_0 : i32, i32
  }
  func.func @transform_16(%arg0: i32) -> (i32, i32) {
    %c0_i32 = arith.constant 0 : i32
    %c0_i32_0 = arith.constant 0 : i32
    %c0_i32_1 = arith.constant 0 : i32
    return %c0_i32, %c0_i32_0 : i32, i32
  }
  func.func @transform_17(%arg0: i32) -> (i32, i32, i32) {
    %c0_i32 = arith.constant 0 : i32
    %c0_i32_0 = arith.constant 0 : i32
    %c0_i32_1 = arith.constant 0 : i32
    return %arg0, %c0_i32, %c0_i32_0 : i32, i32, i32
  }
}

</mosaic_0001>

<bundles_post_ra>
// kernel: decoder_layer_forward.1
= control target key start
LH: loop header
LB: loop body
LE: loop exit
PB: predicated region body
PF: predicated region fallthrough
CT: control target
= control target key end

     0   :  { %s6601_s0 = inlined_call_operand.vmem [shape: f32[2,8,32], index: 0, kind: input, shape index: {}]   ;;  %s6602_s1 = inlined_call_operand.vmem [shape: f32[2,10,32], index: 1, kind: input, shape index: {}]   ;;  %s6603_s2 = inlined_call_operand.vmem [shape: f32[32,96], index: 2, kind: input, shape index: {}]   ;;  %s6604_s3 = inlined_call_operand.vmem [shape: f32[1,96], index: 3, kind: input, shape index: {}]   ;;  %s6605_s4 = inlined_call_operand.vmem [shape: f32[32,32], index: 4, kind: input, shape index: {}]   ;;  %s6606_s5 = inlined_call_operand.hbm [shape: f32[1,32], index: 5, kind: input, shape index: {}]   ;;  %s6607_s6 = inlined_call_operand.vmem [shape: f32[32,32], index: 6, kind: input, shape index: {}]   ;;  %s6608_s7 = inlined_call_operand.hbm [shape: f32[1,32], index: 7, kind: input, shape index: {}]   ;;  %s6609_s8 = inlined_call_operand.vmem [shape: f32[32,64], index: 8, kind: input, shape index: {}]   ;;  %s6610_s9 = inlined_call_operand.hbm [shape: f32[1,64], index: 9, kind: input, shape index: {}]   ;;  %s6611_s10 = inlined_call_operand.hbm [shape: f32[32,32], index: 10, kind: input, shape index: {}]   ;;  %s6612_s11 = inlined_call_operand.hbm [shape: f32[1,32], index: 11, kind: input, shape index: {}]   ;;  %s6613_s12 = inlined_call_operand.hbm [shape: f32[6,32], index: 12, kind: input, shape index: {}]   ;;  %s6614_s13 = inlined_call_operand.hbm [shape: f32[32,64], index: 13, kind: input, shape index: {}]   ;;  %s6615_s14 = inlined_call_operand.hbm [shape: f32[1,64], index: 14, kind: input, shape index: {}]   ;;  %s6616_s15 = inlined_call_operand.vmem [shape: f32[64,32], index: 15, kind: input, shape index: {}]   ;;  %s6617_s16 = inlined_call_operand.hbm [shape: f32[1,32], index: 16, kind: input, shape index: {}]   ;;  %s6618_s17 = inlined_call_operand.hbm [shape: f32[2,8,32], index: 17, kind: output, shape index: {}]  }
   0x1   :  { %6660 = sst [smem:[#allocation32_spill]] %s6601_s0 }
   0x2   :  { %6661 = sst [smem:[#allocation33_spill]] %s6602_s1 }
   0x3   :  { %6662 = sst [smem:[#allocation34_spill]] %s6608_s7 }
   0x4   :  { %6663 = sst [smem:[#allocation35_spill]] %s6618_s17 }
   0x5   :  { %22 = vsyncpa [#allocation3], 0 }
   0x6   :  { %23 = vsyncpa [#allocation6], 0 }
   0x7   :  { %24 = vsyncpa [#allocation9], 0 }
   0x8   :  { %25 = vsyncpa [#allocation12], 0 }
   0x9   :  { %26 = vsyncpa [#allocation15], 0 }
   0xa   :  { %27 = vsyncpa [#allocation4], 0 }
   0xb   :  { %29 = vsyncpa [#allocation4 + $0x1], 0  ;;  %s5772_s24 = smov 0   ;;  %s5774_s25 = smov 0  }
   0xc   :  { %s5776_s26 = smov 0   ;;  %s5778_s27 = smov 0  }
   0xd LB: > { %6664 = sst [smem:[#allocation24_spill]] %s5622_s24  ;;  %s5793_s28 = sadd.s32 4294967295, %s5634_s27   ;;  %s5634_s27 = sphi %s5778_s27, %s6727_s27   ;;  %s5630_s26 = sphi %s5776_s26, %s6730_s26   ;;  %s5626_s25 = sphi %s5774_s25, %s6729_s25   ;;  %s5622_s24 = sphi %s5772_s24, %s6728_s24  }
   0xe   : > { %6665 = sst [smem:[#allocation25_spill]] %s5626_s25  ;;  %s4356_s29 = sadd.s32 4294967294, %s5634_s27  }
   0xf   : > { %6666 = sst [smem:[#allocation26_spill]] %s5630_s26  ;;  %s5797_s0 = sadd.s32 1, %s5634_s27  }
  0x10   : > { %6667 = sst [smem:[#allocation27_spill]] %s5634_s27  ;;  %s409_s30 = sadd.s32 1, %s5630_s26 }
  0x11   : > { %6668 = sst [smem:[#allocation28_spill]] %s5797_s0  ;;  %s406_s18 = ssub.s32 %s5634_s27, %s5797_s0 }
  0x12   : > { %p419_p0 = scmp.ne.s32.totalorder %s5630_s26, %s5626_s25  ;;  %p407_p1 = scmp.eq.s32.totalorder %s406_s18, 0 }
  0x13   : > { %p420_p2 = scmp.eq.s32.totalorder %s5793_s28, 1  ;;  %p425_p3 = scmp.ne.s32.totalorder %s5626_s25, %s5622_s24 }
  0x14   : > { %p426_p4 = scmp.eq.s32.totalorder %s4356_s29, 1  ;;  %p4357_p7 = scmp.ge.s32.totalorder %s5634_s27, 1 }
  0x15   : > { %s5808_s19 = scalar_select %p407_p1, %s5630_s26, %s409_s30  }
  0x16   : > { %p5810_p5 = por %p420_p2, %p419_p0  ;;  %p5814_p6 = por %p426_p4, %p425_p3 }
  0x17   : > { %6669 = sst [smem:[#allocation29_spill]] %s5808_s19  ;;  %p433_p8 = scmp.lt.s32.totalorder %s5634_s27, 3 }
  0x18   : > { %s6670_s1 = scalar_select %p5810_p5, 1, 0 }
  0x19   : > { %s6672_s20 = scalar_select %p5814_p6, 1, 0 }
  0x1a   : > { %6671 = sst [smem:[#allocation30_spill]] %s6670_s1  ;;  %p6626_p9 = scmp.eq.s32.totalorder %s5793_s28, 0 }
  0x1b   : > { %6673 = sst [smem:[#allocation31_spill]] %s6672_s20  ;;  %p5821_p10 = pnand %p4357_p7, %p433_p8 }
  0x1c   : > { %s5636_s22 = smov [#allocation5]   ;;  %s5637_s29 = smov [#allocation8]  }
  0x1d   : > { %s6674_s21 = scalar_select %p5821_p10, 1, 0 }
  0x1e   : > { %s469_s23 = sshll.u32 %s5636_s22, 4  ;;  %p5021_p11 = pneg %p5821_p10  ;;  %s470_s23 = int_to_ptr.vmem [resolvable:$true] %s469_s23 }
  0x1f   : > { %s493_s30 = sshll.u32 %s5637_s29, 4  ;;  %s5638_s19 = smov [#allocation11]   ;;  %s5833_s30 = int_to_ptr.vmem [resolvable:$true] %s493_s30 }
  0x20   : > { %p5829_p12 = pnand %p6626_p9, %p5021_p11  ;;  %s5835_s26 = sshll.u32 %s5638_s19, 4  ;;  %s519_s26 = int_to_ptr.vmem [resolvable:$true] %s5835_s26 }
  0x21   : > { %s6676_s7 = sld [smem:[#allocation34_spill]] }
  0x22   : > { %p5845_p0 = pneg %p5829_p12 }
  0x27   : > { %s5300_s22 = scalar_lea.hbm %s6676_s7, 16 }
  0x28   : > { %p5301_p13 = scmp.ne.s32.totalorder %s6676_s7, %s5300_s22  ;;  %p5307_p3 = scmp.lt.u32.totalorder %s5300_s22, %s6676_s7 }
  0x2a   : > { %p5303_p1 = pnand %p5845_p0, %p5301_p13 }
  0x2c   : > { %p5304_p2 = pneg %p5303_p1 }
  0x2e   : > { %p5309_p4 = pnand %p5307_p3, %p5304_p2 }
  0x30   : > { %5312 = shalt.err (!%p5309_p4)
}
  0x31   : > { %s5313_s0 = scalar_lea.vmem %s470_s23, 16  ;;  %s5320_s24 = scalar_lea.vmem %s470_s23, 32 }
  0x32   : > { %p5314_p7 = scmp.ne.s32.totalorder %s470_s23, %s5313_s0  ;;  %p5321_p9 = scmp.lt.s32.totalorder %s470_s23, %s470_s23 }
  0x33   : > { %p5322_p6 = scmp.lt.s32.totalorder %s5320_s24, %s5313_s0 }
  0x34   : > { %p5316_p8 = pnand %p5314_p7, %p5845_p0 }
  0x35   : > { %p5323_p5 = por %p5322_p6, %p5321_p9 }
  0x36   : > { %p5317_p11 = pneg %p5316_p8 }
  0x38   : > { %p5324_p10 = pnand %p5323_p5, %p5317_p11 }
  0x3a   : > { %5327 = shalt.err (!%p5324_p10)
}
  0x3b   : > { %5027 = dma.hbm_to_vmem [thread:$0]  (!%p5829_p12), %s6676_s7, 16, %s470_s23, [#allocation6]  }
  0x3c   : > { %s5328_s19 = scalar_lea.hbm %s6611_s10, 512 }
  0x3d   : > { %p5329_p13 = scmp.ne.s32.totalorder %s6611_s10, %s5328_s19  ;;  %p5335_p5 = scmp.lt.u32.totalorder %s5328_s19, %s6611_s10 }
  0x3f   : > { %p5331_p1 = pnand %p5329_p13, %p5845_p0 }
  0x41   : > { %p5332_p6 = pneg %p5331_p1 }
  0x43   : > { %p5337_p9 = pnand %p5335_p5, %p5332_p6 }
  0x45   : > { %5340 = shalt.err (!%p5337_p9)
}
  0x46   : > { %s5341_s23 = scalar_lea.vmem %s5833_s30, 512  ;;  %p5349_p4 = scmp.lt.s32.totalorder %s5833_s30, %s5833_s30 }
  0x47   : > { %p5342_p10 = scmp.ne.s32.totalorder %s5833_s30, %s5341_s23  ;;  %p5350_p7 = scmp.lt.s32.totalorder %s5341_s23, %s5341_s23 }
  0x49   : > { %p5344_p2 = pnand %p5342_p10, %p5845_p0  ;;  %p5351_p8 = por %p5350_p7, %p5349_p4 }
  0x4b   : > { %p5345_p3 = pneg %p5344_p2 }
  0x4d   : > { %p5352_p11 = pnand %p5351_p8, %p5345_p3 }
  0x4f   : > { %5355 = shalt.err (!%p5352_p11)
}
  0x50   : > { %s6632_s25 = smov 128   ;;  %s6633_s1 = smov 8  }
  0x51   : > { %5033 = dma.hbm_to_vmem [thread:$0]  (!%p5829_p12), %s6611_s10, 512, %s5833_s30, [#allocation9], %s6632_s25, %s6632_s25, %s6633_s1  }
  0x52   : > { %s5356_s19 = scalar_lea.hbm %s6613_s12, 128 }
  0x53   : > { %p5357_p13 = scmp.ne.s32.totalorder %s6613_s12, %s5356_s19  ;;  %p5363_p5 = scmp.lt.u32.totalorder %s5356_s19, %s6613_s12 }
  0x55   : > { %p5359_p1 = pnand %p5357_p13, %p5845_p0 }
  0x57   : > { %p5360_p6 = pneg %p5359_p1 }
  0x59   : > { %p5365_p9 = pnand %p5363_p5, %p5360_p6 }
  0x5b   : > { %5368 = shalt.err (!%p5365_p9)
}
  0x5c   : > { %s5369_s27 = scalar_lea.vmem %s519_s26, 128  ;;  %p5377_p4 = scmp.lt.s32.totalorder %s519_s26, %s519_s26 }
  0x5d   : > { %p5370_p10 = scmp.ne.s32.totalorder %s519_s26, %s5369_s27  ;;  %p5378_p7 = scmp.lt.s32.totalorder %s5369_s27, %s5369_s27 }
  0x5f   : > { %p5372_p2 = pnand %p5370_p10, %p5845_p0  ;;  %p5379_p8 = por %p5378_p7, %p5377_p4 }
  0x61   : > { %p5373_p3 = pneg %p5372_p2 }
  0x63   : > { %p5380_p11 = pnand %p5379_p8, %p5373_p3 }
  0x65   : > { %5383 = shalt.err (!%p5380_p11)
}
  0x66   : > { %5039 = dma.hbm_to_vmem [thread:$0]  (!%p5829_p12), %s6613_s12, 128, %s519_s26, [#allocation12]  }
  0x67   : > { %s5641_s7 = smov [#allocation14]   ;;  %s5642_s22 = smov [#allocation2]  }
  0x68   : > { %s542_s17 = sshll.u32 %s5641_s7, 4  ;;  %s455_s19 = sshll.u32 %s5642_s22, 4  ;;  %s543_s17 = int_to_ptr.vmem [resolvable:$true] %s542_s17  ;;  %s456_s19 = int_to_ptr.vmem [resolvable:$true] %s455_s19 }
  0x69   : > { %s5384_s23 = scalar_lea.hbm %s6615_s14, 16 }
  0x6a   : > { %p5385_p13 = scmp.ne.s32.totalorder %s6615_s14, %s5384_s23  ;;  %p5391_p5 = scmp.lt.u32.totalorder %s5384_s23, %s6615_s14 }
  0x6c   : > { %p5387_p1 = pnand %p5385_p13, %p5845_p0 }
  0x6e   : > { %p5388_p6 = pneg %p5387_p1 }
  0x70   : > { %p5393_p9 = pnand %p5391_p5, %p5388_p6 }
  0x72   : > { %5396 = shalt.err (!%p5393_p9)
}
  0x73   : > { %s5397_s26 = scalar_lea.vmem %s543_s17, 16  ;;  %s5404_s20 = scalar_lea.vmem %s543_s17, 32 }
  0x74   : > { %p5398_p10 = scmp.ne.s32.totalorder %s543_s17, %s5397_s26  ;;  %p5405_p4 = scmp.lt.s32.totalorder %s543_s17, %s543_s17 }
  0x75   : > { %p5406_p7 = scmp.lt.s32.totalorder %s5404_s20, %s5397_s26 }
  0x76   : > { %p5400_p2 = pnand %p5398_p10, %p5845_p0 }
  0x77   : > { %p5407_p8 = por %p5406_p7, %p5405_p4 }
  0x78   : > { %p5401_p3 = pneg %p5400_p2 }
  0x7a   : > { %p5408_p11 = pnand %p5407_p8, %p5401_p3 }
  0x7c   : > { %5411 = shalt.err (!%p5408_p11)
}
  0x7d   : > { %5045 = dma.hbm_to_vmem [thread:$0]  (!%p5829_p12), %s6615_s14, 16, %s543_s17, [#allocation15]  }
  0x7e   : > { %s5412_s0 = scalar_lea.hbm %s6606_s5, 16 }
  0x7f   : > { %p5413_p13 = scmp.ne.s32.totalorder %s6606_s5, %s5412_s0  ;;  %p5419_p5 = scmp.lt.u32.totalorder %s5412_s0, %s6606_s5 }
  0x81   : > { %p5415_p1 = pnand %p5413_p13, %p5845_p0 }
  0x83   : > { %p5416_p6 = pneg %p5415_p1 }
  0x85   : > { %p5421_p9 = pnand %p5419_p5, %p5416_p6 }
  0x87   : > { %5424 = shalt.err (!%p5421_p9)
}
  0x88   : > { %s5425_s26 = scalar_lea.vmem %s456_s19, 16  ;;  %s5432_s17 = scalar_lea.vmem %s456_s19, 32 }
  0x89   : > { %p5426_p10 = scmp.ne.s32.totalorder %s456_s19, %s5425_s26  ;;  %p5433_p4 = scmp.lt.s32.totalorder %s456_s19, %s456_s19 }
  0x8a   : > { %p5434_p7 = scmp.lt.s32.totalorder %s5432_s17, %s5425_s26 }
  0x8b   : > { %p5428_p2 = pnand %p5426_p10, %p5845_p0 }
  0x8c   : > { %p5435_p8 = por %p5434_p7, %p5433_p4 }
  0x8d   : > { %p5429_p3 = pneg %p5428_p2 }
  0x8f   : > { %p5436_p11 = pnand %p5435_p8, %p5429_p3 }
  0x91   : > { %5439 = shalt.err (!%p5436_p11)
}
  0x92   : > { %5024 = dma.hbm_to_vmem [thread:$0]  (!%p5829_p12), %s6606_s5, 16, %s456_s19, [#allocation3]  }
  0x93   : > { %s5643_s7 = smov [#allocation7]   ;;  %s5644_s22 = smov [#allocation10]  }
  0x94   : > { %s483_s1 = sshll.u32 %s5643_s7, 4  ;;  %s507_s0 = sshll.u32 %s5644_s22, 4  ;;  %s484_s1 = int_to_ptr.vmem [resolvable:$true] %s483_s1  ;;  %s508_s0 = int_to_ptr.vmem [resolvable:$true] %s507_s0 }
  0x95   : > { %s5440_s27 = scalar_lea.hbm %s6610_s9, 16 }
  0x96   : > { %p5441_p13 = scmp.ne.s32.totalorder %s6610_s9, %s5440_s27  ;;  %p5447_p5 = scmp.lt.u32.totalorder %s5440_s27, %s6610_s9 }
  0x98   : > { %p5443_p1 = pnand %p5441_p13, %p5845_p0 }
  0x9a   : > { %p5444_p6 = pneg %p5443_p1 }
  0x9c   : > { %p5449_p9 = pnand %p5447_p5, %p5444_p6 }
  0x9e   : > { %5452 = shalt.err (!%p5449_p9)
}
  0x9f   : > { %s5453_s19 = scalar_lea.vmem %s484_s1, 16  ;;  %s5460_s25 = scalar_lea.vmem %s484_s1, 32 }
  0xa0   : > { %p5454_p10 = scmp.ne.s32.totalorder %s484_s1, %s5453_s19  ;;  %p5461_p4 = scmp.lt.s32.totalorder %s484_s1, %s484_s1 }
  0xa1   : > { %p5462_p7 = scmp.lt.s32.totalorder %s5460_s25, %s5453_s19 }
  0xa2   : > { %p5456_p2 = pnand %p5454_p10, %p5845_p0 }
  0xa3   : > { %p5463_p8 = por %p5462_p7, %p5461_p4 }
  0xa4   : > { %p5457_p3 = pneg %p5456_p2 }
  0xa6   : > { %p5464_p11 = pnand %p5463_p8, %p5457_p3 }
  0xa8   : > { %5467 = shalt.err (!%p5464_p11)
}
  0xa9   : > { %5030 = dma.hbm_to_vmem [thread:$0]  (!%p5829_p12), %s6610_s9, 16, %s484_s1, [#allocation6]  }
  0xaa   : > { %s5468_s27 = scalar_lea.hbm %s6612_s11, 16 }
  0xab   : > { %p5469_p13 = scmp.ne.s32.totalorder %s6612_s11, %s5468_s27  ;;  %p5475_p5 = scmp.lt.u32.totalorder %s5468_s27, %s6612_s11 }
  0xad   : > { %p5471_p1 = pnand %p5469_p13, %p5845_p0 }
  0xaf   : > { %p5472_p6 = pneg %p5471_p1 }
  0xb1   : > { %p5477_p9 = pnand %p5475_p5, %p5472_p6 }
  0xb3   : > { %5480 = shalt.err (!%p5477_p9)
}
  0xb4   : > { %s5481_s19 = scalar_lea.vmem %s508_s0, 16  ;;  %s5488_s1 = scalar_lea.vmem %s508_s0, 32 }
  0xb5   : > { %p5482_p10 = scmp.ne.s32.totalorder %s508_s0, %s5481_s19  ;;  %p5489_p4 = scmp.lt.s32.totalorder %s508_s0, %s508_s0 }
  0xb6   : > { %p5490_p7 = scmp.lt.s32.totalorder %s5488_s1, %s5481_s19 }
  0xb7   : > { %p5484_p2 = pnand %p5482_p10, %p5845_p0 }
  0xb8   : > { %p5491_p8 = por %p5490_p7, %p5489_p4 }
  0xb9   : > { %p5485_p3 = pneg %p5484_p2 }
  0xbb   : > { %p5492_p11 = pnand %p5491_p8, %p5485_p3 }
  0xbd   : > { %5495 = shalt.err (!%p5492_p11)
}
  0xbe   : > { %5036 = dma.hbm_to_vmem [thread:$0]  (!%p5829_p12), %s6612_s11, 16, %s508_s0, [#allocation9]  }
  0xbf   : > { %s5645_s22 = smov [#allocation13]   ;;  %s5646_s23 = smov [#allocation16]  }
  0xc0   : > { %s528_s24 = sshll.u32 %s5645_s22, 4  ;;  %s556_s27 = sshll.u32 %s5646_s23, 4  ;;  %s529_s24 = int_to_ptr.vmem [resolvable:$true] %s528_s24  ;;  %s557_s27 = int_to_ptr.vmem [resolvable:$true] %s556_s27 }
  0xc1   : > { %s5496_s17 = scalar_lea.hbm %s6614_s13, 512 }
  0xc2   : > { %p5497_p13 = scmp.ne.s32.totalorder %s6614_s13, %s5496_s17  ;;  %p5503_p5 = scmp.lt.u32.totalorder %s5496_s17, %s6614_s13 }
  0xc4   : > { %p5499_p1 = pnand %p5497_p13, %p5845_p0 }
  0xc6   : > { %p5500_p6 = pneg %p5499_p1 }
  0xc8   : > { %p5505_p9 = pnand %p5503_p5, %p5500_p6 }
  0xca   : > { %5508 = shalt.err (!%p5505_p9)
}
  0xcb   : > { %s5509_s0 = scalar_lea.vmem %s529_s24, 512  ;;  %p5517_p4 = scmp.lt.s32.totalorder %s529_s24, %s529_s24 }
  0xcc   : > { %p5510_p10 = scmp.ne.s32.totalorder %s529_s24, %s5509_s0  ;;  %p5518_p7 = scmp.lt.s32.totalorder %s5509_s0, %s5509_s0 }
  0xce   : > { %p5512_p2 = pnand %p5510_p10, %p5845_p0  ;;  %p5519_p8 = por %p5518_p7, %p5517_p4 }
  0xd0   : > { %p5513_p3 = pneg %p5512_p2 }
  0xd2   : > { %p5520_p11 = pnand %p5519_p8, %p5513_p3 }
  0xd4   : > { %5523 = shalt.err (!%p5520_p11)
}
  0xd5   : > { %s6678_s7 = smov 8   ;;  %s6679_s22 = smov 128  }
  0xd6   : > { %5042 = dma.hbm_to_vmem [thread:$0]  (!%p5829_p12), %s6614_s13, 512, %s529_s24, [#allocation12], %s6679_s22, %s6679_s22, %s6678_s7  }
  0xd7   : > { %s5524_s20 = scalar_lea.hbm %s6617_s16, 16 }
  0xd8   : > { %p5525_p13 = scmp.ne.s32.totalorder %s6617_s16, %s5524_s20  ;;  %p5531_p5 = scmp.lt.u32.totalorder %s5524_s20, %s6617_s16 }
  0xda   : > { %p5527_p1 = pnand %p5525_p13, %p5845_p0 }
  0xdc   : > { %p5528_p6 = pneg %p5527_p1 }
  0xde   : > { %p5533_p9 = pnand %p5531_p5, %p5528_p6 }
  0xe0   : > { %5536 = shalt.err (!%p5533_p9)
}
  0xe1   : > { %s5537_s23 = scalar_lea.vmem %s557_s27, 16  ;;  %s5544_s24 = scalar_lea.vmem %s557_s27, 32 }
  0xe2   : > { %p5538_p10 = scmp.ne.s32.totalorder %s557_s27, %s5537_s23  ;;  %p5545_p4 = scmp.lt.s32.totalorder %s557_s27, %s557_s27 }
  0xe3   : > { %p5546_p7 = scmp.lt.s32.totalorder %s5544_s24, %s5537_s23 }
  0xe4   : > { %p5540_p2 = pnand %p5538_p10, %p5845_p0 }
  0xe5   : > { %p5547_p8 = por %p5546_p7, %p5545_p4 }
  0xe6   : > { %p5541_p3 = pneg %p5540_p2 }
  0xe8   : > { %p5548_p11 = pnand %p5547_p8, %p5541_p3 }
  0xea   : > { %5551 = shalt.err (!%p5548_p11)
}
  0xeb   : > { %5048 = dma.hbm_to_vmem [thread:$0]  (!%p5829_p12), %s6617_s16, 16, %s557_s27, [#allocation15]  }
  0xec   : > { %p6680_p13 = scmp.ne.s32.totalorder %s6674_s21, 0 }
  0xed   : > { %p6681_p1 = scmp.eq.s32.totalorder (!%p6680_p13), %s5793_s28, 0 }
  0xee   : > { %584 = sbr.rel (%p6680_p13) target bundleno = 7784 (0x1e68), region = 88 }
  0xf5   : > { %5597 = dma.done.wait (%p6681_p1), [#allocation3], 16   ;;  %p6682_p0 = pmov %p6681_p1 }
  0xf7   : > { %5599 = vsyncadd (%p6682_p0), [#allocation3], 4294967280  ;;  %p6683_p6 = pmov %p6682_p0 }
  0xf8   : > { %p6684_p5 = pmov %p6682_p0 }
  0xf9   : > { %5601 = dma.done.wait (%p6683_p6), [#allocation6], 32  }
  0xfa   : > { %5603 = vsyncadd (%p6684_p5), [#allocation6], 4294967264  ;;  %p6685_p9 = pmov %p6682_p0 }
  0xfb   : > { %p6686_p12 = pmov %p6682_p0 }
  0xfc   : > { %5605 = dma.done.wait (%p6685_p9), [#allocation9], 528  }
  0xfd   : > { %5607 = vsyncadd (%p6686_p12), [#allocation9], 4294966768  ;;  %p6687_p10 = pmov %p6682_p0 }
  0xfe   : > { %p6688_p2 = pmov %p6682_p0 }
  0xff   : > { %5609 = dma.done.wait (%p6687_p10), [#allocation12], 640  }
 0x100   : > { %5611 = vsyncadd (%p6688_p2), [#allocation12], 4294966656  ;;  %p6689_p3 = pmov %p6682_p0 }
 0x101   : > { %p6690_p4 = pmov %p6682_p0 }
 0x102   : > { %5613 = dma.done.wait (%p6689_p3), [#allocation15], 32  }
 0x103   : > { %5615 = vsyncadd (%p6690_p4), [#allocation15], 4294967264  ;;  %p672_p7 = scmp.lt.s32.totalorder %s5793_s28, 1  ;;  %v5647_v0 = vmov 0.0|0.0   ;;  %vm5648_vm0 = vmmov 0   ;;  %v5649_v1 = vmov 0.0   ;;  %v769_v30 = vlaneseq }
 0x104   : > { %4869 = vmatprep.subr.bf16.mxu1 %v5647_v0  ;;  %4600 = vmatprep.mubr.msk.f32.mxu1 %vm5648_vm0, %v5649_v1  ;;  %v684_v2 = vld [vmem:[%s6603_s2] sm:$0xff]  ;;  %v685_v3 = vld [vmem:[%s6603_s2 + $0x8] sm:$0xff]  ;;  %v686_v4 = vld [vmem:[%s6603_s2 + $0x10] sm:$0xff]  ;;  %s6691_s23 = sld [smem:[#allocation32_spill]]  ;;  %vm695_vm1 = vcmask 261120   ;;  %s5650_s18 = smov 96  }
 0x105   : > { %4613 = vmatprep.subr.mxu0 %v5649_v1  ;;  %4615 = vmatprep.mubr.msk.f32.mxu0 %vm5648_vm0, %v5649_v1  ;;  %s6047_s21 = scalar_select %p672_p7, %s5793_s28, 1  ;;  %v4870_v5 = vpack.c.bf16 %v685_v3, %v684_v2  ;;  %v687_v6 = vld [vmem:[%s6603_s2 + $0x18] sm:$0xff]  ;;  %v4382_v9 = vld [vmem:[%s6604_s3] ss:$0 sm:$0xff]  ;;  %vm778_vm2 = vcmask 31744   ;;  %v770_v31 = vshrl.u32 %v769_v30, 7 }
 0x106   : > { %v4873_v7 = vpack.c.bf16 %v687_v6, %v686_v4  ;;  %s5651_s29 = smov 124   ;;  %s6657_s27 = smov 92   ;;  %v772_v32 = vand.u32 127, %v769_v30  ;;  %vm855_vm4 = vcmask 64512   ;;  %vm2135_vm5 = vcmask 97280   ;;  %vm6316_vm12 = vmpackc.low %vm778_vm2, %vm778_vm2 }
 0x107   : > { %s4379_s1 = sshll.u32 %s6047_s21, 3  ;;  %4871 = vmatpush3.bf16.msra.mxu1 %v4870_v5  ;;  %s6656_s30 = smov 88   ;;  %vm2137_vm6 = vcmask 130048   ;;  %vm2139_vm7 = vcmask 162816   ;;  %vm2141_vm8 = vcmask 195584   ;;  %vm2143_vm9 = vcmask 228352  }
 0x108   : > { %4872 = vmatprep.subr.bf16.mxu1 %v5647_v0  ;;  %s6658_s26 = smov 120   ;;  %s6645_s17 = smov 84   ;;  %vm6144_vm3 = vcmp.le.s32.totalorder %v772_v32, %v770_v31  ;;  %vm2519_vm13 = vcmask 80896   ;;  %vm2539_vm14 = vcmask 1041408   ;;  %vm5680_vm15 = vmmov 1  }
 0x109   : > { %s6654_s20 = smov 116   ;;  %s6634_s19 = smov 80  }
 0x10a   : > { %s675_s24 = scalar_lea.vmem %s6691_s23, %s4379_s1  ;;  %s6647_s1 = smov 112  }
 0x10b   : > { %4874 = vmatpush3.bf16.msra.mxu1 %v4873_v7  ;;  %v6066_v8 = vld [vmem:[%s675_s24] sm:$0xff]  ;;  %s6639_s25 = smov 76   ;;  %s6643_s0 = smov 108  }
 0x10c   : > { %4603 = vmatprep.subr.mxu1 %v5649_v1  ;;  %s6638_s23 = smov 72   ;;  %s6640_s24 = smov 104  }
 0x10d   : > { %s6635_s7 = smov 68   ;;  %s6636_s22 = smov 100  }
 0x10e   : > { %4601 = vmatmul.mubr.msk.f32.vlgmr.msra.gmra.mrb[0].mxu1 %vm695_vm1, %v6066_v8 }
 0x10f   : > { %4605 = vmatprep.mubr.msk.f32.mxu1 %vm5648_vm0, %v5649_v1 }
 0x1e1   : > { %v765_v10 = vpop.f32.mrb[0].mxu1 }
 0x1e2   : > { %v6076_v11 = vadd.f32 %v4382_v9, %v765_v10  ;;  %v4602_v12 = vpop.f32.mrb[1].mxu1 }
 0x1e4   : > { %776 = vrot.lane.b32.xlu0 %v6076_v11, %s5650_s18  ;;  %v774_v13 = vmul.f32 0.5, %v6076_v11 }
 0x1e6   : > { %943 = vrot.lane.b32.xlu1 %v774_v13, %s5651_s29 }
 0x1e8   : > { %945 = vrot.lane.b32.xlu0 %v6076_v11, %s6657_s27  ;;  %s6701_s27 = smov 88  }
 0x1ea   : > { %1111 = vrot.lane.b32.xlu1 %v6076_v11, %s6656_s30  ;;  %s6702_s30 = smov 116  }
 0x1ec   : > { %1109 = vrot.lane.b32.xlu0 %v774_v13, %s6658_s26  ;;  %s6703_s26 = smov 112  }
 0x1ee   : > { %1277 = vrot.lane.b32.xlu1 %v6076_v11, %s6645_s17  ;;  %s6649_s17 = smov 28  }
 0x1f0   : > { %1275 = vrot.lane.b32.xlu0 %v774_v13, %s6654_s20  ;;  %s6694_s20 = sld [smem:[#allocation33_spill]] }
 0x1f2   : > { %1443 = vrot.lane.b32.xlu1 %v6076_v11, %s6634_s19  ;;  %s5665_s19 = smov 64  }
 0x1f4   : > { %1441 = vrot.lane.b32.xlu0 %v774_v13, %s6647_s1  ;;  %s6651_s1 = smov 12  }
 0x1f6   : > { %1609 = vrot.lane.b32.xlu1 %v6076_v11, %s6639_s25  ;;  %s6653_s25 = smov 16  }
 0x1f8   : > { %1607 = vrot.lane.b32.xlu0 %v774_v13, %s6643_s0  ;;  %s6652_s0 = smov 24  }
 0x1fa   : > { %1775 = vrot.lane.b32.xlu1 %v6076_v11, %s6638_s23  ;;  %s6650_s23 = smov 20  }
 0x1fc   : > { %1773 = vrot.lane.b32.xlu0 %v774_v13, %s6640_s24  ;;  %s6707_s24 = smov 104  }
 0x1fe   : > { %1941 = vrot.lane.b32.xlu1 %v6076_v11, %s6635_s7  ;;  %s5667_s7 = smov 60  }
 0x200   : > { %1939 = vrot.lane.b32.xlu0 %v774_v13, %s6636_s22  ;;  %s5668_s22 = smov 52  }
 0x202   : > { %867 = vrot.lane.b32.xlu1 %v6076_v11, %s5665_s19  ;;  %s5666_s19 = smov 56  }
 0x256   : > { %v777_v14 = vpop.permute.xlu0 %776 }
 0x257   : > { %4604 = vmatpush3.xpose.msk.msra.mxu1 %vm778_vm2, %v777_v14 }
 0x258   : > { %v944_v15 = vpop.permute.xlu1 %943  ;;  %4608 = vmatprep.subr.mxu1 %v5649_v1 }
 0x25a   : > { %v946_v16 = vpop.permute.xlu0 %945  ;;  %4606 = vmatmul.mubr.msk.f32.vlgmr.msra.gmra.mrb[2].mxu1 %vm778_vm2, %v774_v13 }
 0x25b   : > { %4614 = vmatpush3.xpose.msk.msra.mxu0 %vm778_vm2, %v946_v16  ;;  %4610 = vmatprep.mubr.msk.f32.mxu1 %vm5648_vm0, %v5649_v1 }
 0x25c   : > { %v1112_v17 = vpop.permute.xlu1 %1111  ;;  %4623 = vmatprep.subr.mxu0 %v5649_v1 }
 0x25e   : > { %v1110_v18 = vpop.permute.xlu0 %1109  ;;  %4616 = vmatmul.mubr.msk.f32.vlgmr.msra.gmra.mrb[0].mxu0 %vm778_vm2, %v944_v15 }
 0x25f   : > { %4624 = vmatpush3.xpose.msk.msra.mxu0 %vm778_vm2, %v1112_v17  ;;  %4625 = vmatprep.mubr.msk.f32.mxu0 %vm5648_vm0, %v5649_v1 }
 0x260   : > { %v1278_v19 = vpop.permute.xlu1 %1277  ;;  %4633 = vmatprep.subr.mxu0 %v5649_v1 }
 0x262   : > { %v1276_v20 = vpop.permute.xlu0 %1275  ;;  %4626 = vmatmul.mubr.msk.f32.vlgmr.msra.gmra.mrb[2].mxu0 %vm778_vm2, %v1110_v18 }
 0x263   : > { %4634 = vmatpush3.xpose.msk.msra.mxu0 %vm778_vm2, %v1278_v19  ;;  %4635 = vmatprep.mubr.msk.f32.mxu0 %vm5648_vm0, %v5649_v1 }
 0x264   : > { %v1444_v21 = vpop.permute.xlu1 %1443  ;;  %4643 = vmatprep.subr.mxu0 %v5649_v1 }
 0x266   : > { %v1442_v22 = vpop.permute.xlu0 %1441  ;;  %4636 = vmatmul.mubr.msk.f32.vlgmr.msra.gmra.mrb[4].mxu0 %vm778_vm2, %v1276_v20 }
 0x267   : > { %4644 = vmatpush3.xpose.msk.msra.mxu0 %vm778_vm2, %v1444_v21  ;;  %4645 = vmatprep.mubr.msk.f32.mxu0 %vm5648_vm0, %v5649_v1 }
 0x268   : > { %v1610_v23 = vpop.permute.xlu1 %1609  ;;  %4653 = vmatprep.subr.mxu0 %v5649_v1 }
 0x26a   : > { %v1608_v24 = vpop.permute.xlu0 %1607  ;;  %4646 = vmatmul.mubr.msk.f32.vlgmr.msra.gmra.mrb[6].mxu0 %vm778_vm2, %v1442_v22 }
 0x26b   : > { %4654 = vmatpush3.xpose.msk.msra.mxu0 %vm778_vm2, %v1610_v23  ;;  %4655 = vmatprep.mubr.msk.f32.mxu0 %vm5648_vm0, %v5649_v1 }
 0x26c   : > { %v1776_v25 = vpop.permute.xlu1 %1775  ;;  %4663 = vmatprep.subr.mxu0 %v5649_v1 }
 0x26e   : > { %4656 = vmatmul.mubr.msk.f32.vlgmr.msra.gmra.mrb[8].mxu0 %vm778_vm2, %v1608_v24  ;;  %v1774_v26 = vpop.permute.xlu0 %1773 }
 0x26f   : > { %4664 = vmatpush3.xpose.msk.msra.mxu0 %vm778_vm2, %v1776_v25  ;;  %4665 = vmatprep.mubr.msk.f32.mxu0 %vm5648_vm0, %v5649_v1 }
 0x270   : > { %v1942_v27 = vpop.permute.xlu1 %1941  ;;  %4673 = vmatprep.subr.mxu0 %v5649_v1 }
 0x272   : > { %4666 = vmatmul.mubr.msk.f32.vlgmr.msra.gmra.mrb[10].mxu0 %vm778_vm2, %v1774_v26  ;;  %v1940_v29 = vpop.permute.xlu0 %1939 }
 0x273   : > { %4674 = vmatpush3.xpose.msk.msra.mxu0 %vm778_vm2, %v1942_v27  ;;  %4675 = vmatprep.mubr.msk.f32.mxu0 %vm5648_vm0, %v5649_v1 }
 0x274   : > { %v868_v28 = vpop.permute.xlu1 %867  ;;  %4875 = vmatprep.subr.bf16.mxu0 %v5647_v0 }
 0x275   : > { %4609 = vmatpush3.msra.mxu1 %v868_v28 }
 0x276   : > { %4676 = vmatmul.mubr.msk.f32.vlgmr.msra.gmra.mrb[12].mxu0 %vm778_vm2, %v1940_v29  ;;  %4618 = vmatprep.subr.mxu1 %v5649_v1 }
 0x277   : > { %4691 = vmatprep.mubr.msk.f32.mxu0 %vm5648_vm0, %v5649_v1 }
 0x32d   : > { %v850_v34 = vpop.f32.mrb[2].mxu1 }
 0x32e   : > { %v854_v35 = vsel %vm6144_vm3, %v850_v34, -1e+09  ;;  %v4607_v36 = vpop.f32.mrb[3].mxu1 }
 0x32f   : > { %v856_v37 = vsel %vm855_vm4, %v854_v35, -inf }
 0x330   : > { %857 = vmax.xlane.f32.xlu1 %v856_v37 }
 0x331   : > { %v1017_v38 = vpop.f32.mrb[0].mxu0 }
 0x332   : > { %v1021_v39 = vsel %vm6144_vm3, %v1017_v38, -1e+09  ;;  %v4617_v40 = vpop.f32.mrb[1].mxu0 }
 0x333   : > { %v1022_v41 = vsel %vm855_vm4, %v1021_v39, -inf }
 0x334   : > { %1023 = vmax.xlane.f32.xlu0 %v1022_v41 }
 0x335   : > { %v1183_v42 = vpop.f32.mrb[2].mxu0 }
 0x336   : > { %v1187_v43 = vsel %vm6144_vm3, %v1183_v42, -1e+09  ;;  %v4627_v44 = vpop.f32.mrb[3].mxu0 }
 0x337   : > { %v1188_v45 = vsel %vm855_vm4, %v1187_v43, -inf }
 0x338   : > { %1189 = vmax.xlane.f32.xlu0 %v1188_v45 }
 0x339   : > { %v1349_v46 = vpop.f32.mrb[4].mxu0 }
 0x33a   : > { %v1353_v47 = vsel %vm6144_vm3, %v1349_v46, -1e+09  ;;  %v4637_v48 = vpop.f32.mrb[5].mxu0 }
 0x33b   : > { %v1354_v49 = vsel %vm855_vm4, %v1353_v47, -inf }
 0x33c   : > { %1355 = vmax.xlane.f32.xlu1 %v1354_v49 }
 0x33d   : > { %v1515_v50 = vpop.f32.mrb[6].mxu0 }
 0x33e   : > { %v1519_v51 = vsel %vm6144_vm3, %v1515_v50, -1e+09  ;;  %v4647_v52 = vpop.f32.mrb[7].mxu0 }
 0x33f   : > { %v1520_v53 = vsel %vm855_vm4, %v1519_v51, -inf }
 0x340   : > { %1521 = vmax.xlane.f32.xlu0 %v1520_v53 }
 0x341   : > { %v1681_v54 = vpop.f32.mrb[8].mxu0 }
 0x342   : > { %v1685_v55 = vsel %vm6144_vm3, %v1681_v54, -1e+09  ;;  %v4657_v56 = vpop.f32.mrb[9].mxu0 }
 0x343   : > { %v1686_v57 = vsel %vm855_vm4, %v1685_v55, -inf }
 0x344   : > { %1687 = vmax.xlane.f32.xlu1 %v1686_v57 }
 0x345   : > { %v1847_v58 = vpop.f32.mrb[10].mxu0 }
 0x346   : > { %v1851_v59 = vsel %vm6144_vm3, %v1847_v58, -1e+09  ;;  %v4667_v60 = vpop.f32.mrb[11].mxu0 }
 0x347   : > { %v1852_v61 = vsel %vm855_vm4, %v1851_v59, -inf }
 0x348   : > { %1853 = vmax.xlane.f32.xlu0 %v1852_v61 }
 0x349   : > { %v2013_v62 = vpop.f32.mrb[12].mxu0 }
 0x34a   : > { %v2017_v63 = vsel %vm6144_vm3, %v2013_v62, -1e+09  ;;  %v4677_v2 = vpop.f32.mrb[13].mxu0  ;;  %vm6350_vm3 = vmpackc.low %vm2539_vm14, %vm5680_vm15 }
 0x34b   : > { %v2018_v3 = vsel %vm855_vm4, %v2017_v63, -inf }
 0x355   : > { %1199 = vrot.lane.b32.xlu1 %v6076_v11, %s5666_s19  ;;  %s5671_s19 = smov 40  }
 0x35e   : > { %1033 = vrot.lane.b32.xlu0 %v6076_v11, %s5667_s7  ;;  %s5669_s7 = smov 48  }
 0x379   : > { %2019 = vmax.xlane.f32.xlu1 %v2018_v3 }
 0x38a   : > { %1365 = vrot.lane.b32.xlu1 %v6076_v11, %s5668_s22  ;;  %s5670_s22 = smov 44  }
 0x3bd   : > { %v858_v4 = vpop.xlane.xlu1 %857 }
 0x3be   : > { %v859_v5 = vsub.f32 %v854_v35, %v858_v4 }
 0x3c0   : > { %v860_v6 = vmul.f32 1.442695, %v859_v5 }
 0x3c1   : > { %v1024_v7 = vpop.xlane.xlu0 %1023 }
 0x3c2   : > { %5224 = vpow2.f32 %v860_v6  ;;  %v1025_v9 = vsub.f32 %v1021_v39, %v1024_v7 }
 0x3c4   : > { %v1026_v10 = vmul.f32 1.442695, %v1025_v9 }
 0x3c5   : > { %v1190_v12 = vpop.xlane.xlu0 %1189 }
 0x3c6   : > { %5226 = vpow2.f32 %v1026_v10  ;;  %v1191_v13 = vsub.f32 %v1187_v43, %v1190_v12 }
 0x3c8   : > { %v1192_v14 = vmul.f32 1.442695, %v1191_v13 }
 0x3c9   : > { %v1356_v21 = vpop.xlane.xlu1 %1355 }
 0x3ca   : > { %5228 = vpow2.f32 %v1192_v14  ;;  %v1357_v22 = vsub.f32 %v1353_v47, %v1356_v21 }
 0x3cc   : > { %v5225_v15 = vpop.eup %5224  ;;  %v1358_v26 = vmul.f32 1.442695, %v1357_v22  ;;  %v2145_v22 = vld [vmem:[%s6605_s4] sm:$0xff] }
 0x3cd   : > { %v862_v16 = vsel %vm855_vm4, %v5225_v15, 0.0  ;;  %v1522_v23 = vpop.xlane.xlu0 %1521 }
 0x3ce   : > { %863 = vadd.xlane.f32.xlu0 %v862_v16  ;;  %v1523_v25 = vsub.f32 %v1519_v51, %v1522_v23  ;;  %5230 = vpow2.f32 %v1358_v26  ;;  %v2146_v23 = vld [vmem:[%s6605_s4 + $0x8] sm:$0xff]  ;;  %v2147_v26 = vld [vmem:[%s6605_s4 + $0x10] sm:$0xff] }
 0x3d0   : > { %v6176_v17 = vpop.eup %5226  ;;  %v1524_v29 = vmul.f32 1.442695, %v1523_v25 }
 0x3d1   : > { %v1028_v18 = vsel %vm855_vm4, %v6176_v17, 0.0  ;;  %v1688_v24 = vpop.xlane.xlu1 %1687 }
 0x3d2   : > { %1029 = vadd.xlane.f32.xlu1 %v1028_v18  ;;  %v1689_v27 = vsub.f32 %v1685_v55, %v1688_v24  ;;  %5232 = vpow2.f32 %v1524_v29  ;;  %v4876_v24 = vpack.c.bf16 %v2146_v23, %v2145_v22  ;;  %v4410_v23 = vld [vmem:[#allocation11] ss:$0 sm:$0xff] }
 0x3d4   : > { %v6180_v19 = vpop.eup %5228  ;;  %v1690_v30 = vmul.f32 1.442695, %v1689_v27  ;;  %4877 = vmatpush3.bf16.msra.mxu0 %v4876_v24  ;;  %v2148_v27 = vld [vmem:[%s6605_s4 + $0x18] sm:$0xff] }
 0x3d5   : > { %v1194_v20 = vsel %vm855_vm4, %v6180_v19, 0.0  ;;  %v1854_v28 = vpop.xlane.xlu0 %1853  ;;  %v1200_v33 = vpop.permute.xlu1 %1199  ;;  %4878 = vmatprep.subr.bf16.mxu0 %v5647_v0  ;;  %v4879_v29 = vpack.c.bf16 %v2148_v27, %v2147_v26  ;;  %v4411_v26 = vld [vmem:[#allocation11 + $0x1] ss:$0 sm:$0xff] }
 0x3d6   : > { %1195 = vadd.xlane.f32.xlu0 %v1194_v20  ;;  %v1855_v31 = vsub.f32 %v1851_v59, %v1854_v28  ;;  %5234 = vpow2.f32 %v1690_v30 }
 0x3d8   : > { %v1856_v32 = vmul.f32 1.442695, %v1855_v31  ;;  %v5231_v34 = vpop.eup %5230  ;;  %4880 = vmatpush3.bf16.msra.mxu0 %v4879_v29  ;;  %v4414_v29 = vld [vmem:[#allocation7] ss:$0 sm:$0xff] }
 0x3d9   : > { %v1360_v37 = vsel %vm855_vm4, %v5231_v34, 0.0  ;;  %v1034_v47 = vpop.permute.xlu0 %1033 }
 0x3da   : > { %5236 = vpow2.f32 %v1856_v32 }
 0x3dc   : > { %v6186_v35 = vpop.eup %5232 }
 0x3dd   : > { %v1526_v41 = vsel %vm855_vm4, %v6186_v35, 0.0 }
 0x3e0   : > { %v6189_v38 = vpop.eup %5234 }
 0x3e1   : > { %v1692_v42 = vsel %vm855_vm4, %v6189_v38, 0.0 }
 0x3e3   : > { %1531 = vrot.lane.b32.xlu1 %v6076_v11, %s5669_s7  ;;  %s5672_s7 = smov 36  }
 0x3e4   : > { %v6195_v43 = vpop.eup %5236 }
 0x3e5   : > { %v1858_v44 = vsel %vm855_vm4, %v6195_v43, 0.0 }
 0x3ec   : > { %1697 = vrot.lane.b32.xlu0 %v6076_v11, %s5670_s22  ;;  %s6642_s22 = smov 4  }
 0x406   : > { %v2020_v36 = vpop.xlane.xlu1 %2019 }
 0x407   : > { %v2021_v39 = vsub.f32 %v2017_v63, %v2020_v36  ;;  %1361 = vadd.xlane.f32.xlu1 %v1360_v37 }
 0x409   : > { %v2022_v40 = vmul.f32 1.442695, %v2021_v39 }
 0x40a   : > { %v1366_v48 = vpop.permute.xlu1 %1365 }
 0x40b   : > { %5238 = vpow2.f32 %v2022_v40  ;;  %1527 = vadd.xlane.f32.xlu0 %v1526_v41  ;;  %1693 = vadd.xlane.f32.xlu1 %v1692_v42 }
 0x40f   : > { %1859 = vadd.xlane.f32.xlu0 %v1858_v44 }
 0x415   : > { %v6199_v45 = vpop.eup %5238 }
 0x416   : > { %v2024_v46 = vsel %vm855_vm4, %v6199_v45, 0.0 }
 0x417   : > { %2025 = vadd.xlane.f32.xlu0 %v2024_v46 }
 0x41c   : > { %1863 = vrot.lane.b32.xlu1 %v6076_v11, %s5671_s19  ;;  %s6646_s19 = smov 8  }
 0x42d   : > { %2029 = vrot.lane.b32.xlu0 %v6076_v11, %s5672_s7  ;;  %s6710_s7 = smov 100  }
 0x45b   : > { %v864_v49 = vpop.xlane.xlu0 %863 }
 0x45c   : > { %5240 = vrcp.f32 %v864_v49 }
 0x45f   : > { %v1030_v50 = vpop.xlane.xlu1 %1029 }
 0x460   : > { %5242 = vrcp.f32 %v1030_v50 }
 0x463   : > { %v1196_v51 = vpop.xlane.xlu0 %1195  ;;  %v1532_v57 = vpop.permute.xlu1 %1531 }
 0x464   : > { %5244 = vrcp.f32 %v1196_v51 }
 0x466   : > { %v5241_v52 = vpop.eup %5240 }
 0x467   : > { %v866_v53 = vmul.f32 %v5241_v52, %v5225_v15  ;;  %v1698_v58 = vpop.permute.xlu0 %1697  ;;  %v4408_v52 = vld [vmem:[#allocation2] ss:$0 sm:$0xff] }
 0x469   : > { %4611 = vmatmul.mubr.msk.f32.vlgmr.msra.gmra.mrb[4].mxu1 %vm855_vm4, %v866_v53 }
 0x46a   : > { %v5243_v54 = vpop.eup %5242  ;;  %4619 = vmatpush3.msra.mxu1 %v1034_v47  ;;  %4620 = vmatprep.mubr.msk.f32.mxu1 %vm5648_vm0, %v5649_v1 }
 0x46b   : > { %v1032_v55 = vmul.f32 %v5243_v54, %v6176_v17  ;;  %4628 = vmatprep.subr.mxu1 %v5649_v1 }
 0x46d   : > { %4621 = vmatmul.mubr.msk.f32.vlgmr.msra.gmra.mrb[6].mxu1 %vm855_vm4, %v1032_v55 }
 0x46e   : > { %v5245_v11 = vpop.eup %5244  ;;  %4629 = vmatpush3.msra.mxu1 %v1200_v33  ;;  %4630 = vmatprep.mubr.msk.f32.mxu1 %vm5648_vm0, %v5649_v1 }
 0x46f   : > { %v1198_v56 = vmul.f32 %v5245_v11, %v6180_v19  ;;  %4638 = vmatprep.subr.mxu1 %v5649_v1 }
 0x471   : > { %4631 = vmatmul.mubr.msk.f32.vlgmr.msra.gmra.mrb[8].mxu1 %vm855_vm4, %v1198_v56 }
 0x472   : > { %4639 = vmatpush3.msra.mxu1 %v1366_v48  ;;  %4640 = vmatprep.mubr.msk.f32.mxu1 %vm5648_vm0, %v5649_v1 }
 0x473   : > { %4648 = vmatprep.subr.mxu1 %v5649_v1 }
 0x494   : > { %v1362_v59 = vpop.xlane.xlu1 %1361 }
 0x495   : > { %5246 = vrcp.f32 %v1362_v59 }
 0x498   : > { %v1528_v60 = vpop.xlane.xlu0 %1527  ;;  %v1694_v61 = vpop.xlane.xlu1 %1693 }
 0x499   : > { %5248 = vrcp.f32 %v1528_v60 }
 0x49a   : > { %5250 = vrcp.f32 %v1694_v61 }
 0x49c   : > { %v1860_v62 = vpop.xlane.xlu0 %1859  ;;  %v1864_v10 = vpop.permute.xlu1 %1863 }
 0x49d   : > { %5252 = vrcp.f32 %v1860_v62  ;;  %v2347_v62 = vld [vmem:[%s6609_s8] sm:$0xff] }
 0x49f   : > { %v5247_v63 = vpop.eup %5246 }
 0x4a0   : > { %v1364_v2 = vmul.f32 %v5247_v63, %v5231_v34  ;;  %v2348_v63 = vld [vmem:[%s6609_s8 + $0x8] sm:$0xff] }
 0x4a2   : > { %4641 = vmatmul.mubr.msk.f32.vlgmr.msra.gmra.mrb[10].mxu1 %vm855_vm4, %v1364_v2  ;;  %v2349_v2 = vld [vmem:[%s6609_s8 + $0x10] sm:$0xff] }
 0x4a3   : > { %v5249_v3 = vpop.eup %5248  ;;  %4649 = vmatpush3.msra.mxu1 %v1532_v57  ;;  %4650 = vmatprep.mubr.msk.f32.mxu1 %vm5648_vm0, %v5649_v1 }
 0x4a4   : > { %v1530_v4 = vmul.f32 %v5249_v3, %v6186_v35  ;;  %v2026_v5 = vpop.xlane.xlu0 %2025  ;;  %4658 = vmatprep.subr.mxu1 %v5649_v1  ;;  %v5251_v6 = vpop.eup %5250  ;;  %v2350_v3 = vld [vmem:[%s6609_s8 + $0x18] sm:$0xff] }
 0x4a5   : > { %5254 = vrcp.f32 %v2026_v5  ;;  %v1696_v7 = vmul.f32 %v5251_v6, %v6189_v38  ;;  %v2263_v5 = vld [vmem:[%s6607_s6] sm:$0xff]  ;;  %v2264_v6 = vld [vmem:[%s6607_s6 + $0x8] sm:$0xff] }
 0x4a6   : > { %4651 = vmatmul.mubr.msk.f32.vlgmr.msra.gmra.mrb[12].mxu1 %vm855_vm4, %v1530_v4  ;;  %v4891_v4 = vpack.c.bf16 %v2350_v3, %v2349_v2 }
 0x4a7   : > { %4659 = vmatpush3.msra.mxu1 %v1698_v58  ;;  %4660 = vmatprep.mubr.msk.f32.mxu1 %vm5648_vm0, %v5649_v1  ;;  %v5253_v9 = vpop.eup %5252 }
 0x4a8   : > { %4668 = vmatprep.subr.mxu1 %v5649_v1  ;;  %v1862_v12 = vmul.f32 %v5253_v9, %v6195_v43  ;;  %v2030_v13 = vpop.permute.xlu0 %2029 }
 0x4aa   : > { %4661 = vmatmul.mubr.msk.f32.vlgmr.msra.gmra.mrb[14].mxu1 %vm855_vm4, %v1696_v7  ;;  %v2265_v7 = vld [vmem:[%s6607_s6 + $0x10] sm:$0xff] }
 0x4ab   : > { %4669 = vmatpush3.msra.mxu1 %v1864_v10  ;;  %4670 = vmatprep.mubr.msk.f32.mxu1 %vm5648_vm0, %v5649_v1 }
 0x4ac   : > { %4678 = vmatprep.subr.mxu1 %v5649_v1 }
 0x4ae   : > { %4671 = vmatmul.mubr.msk.f32.vlgmr.msra.gmra.mrb[16].mxu1 %vm855_vm4, %v1862_v12  ;;  %v4882_v12 = vpack.c.bf16 %v2264_v6, %v2263_v5 }
 0x4af   : > { %v5255_v14 = vpop.eup %5254  ;;  %4679 = vmatpush3.msra.mxu1 %v2030_v13  ;;  %4680 = vmatprep.mubr.msk.f32.mxu1 %vm5648_vm0, %v5649_v1  ;;  %v2266_v13 = vld [vmem:[%s6607_s6 + $0x18] sm:$0xff] }
 0x4b0   : > { %v2028_v15 = vmul.f32 %v5255_v14, %v6199_v45  ;;  %4881 = vmatprep.subr.bf16.mxu1 %v5647_v0  ;;  %v4885_v14 = vpack.c.bf16 %v2266_v13, %v2265_v7 }
 0x4b2   : > { %4681 = vmatmul.mubr.msk.f32.vlgmr.msra.gmra.mrb[18].mxu1 %vm855_vm4, %v2028_v15 }
 0x4b3   : > { %4702 = vmatprep.mubr.msk.f32.mxu1 %vm5648_vm0, %v5649_v1  ;;  %4883 = vmatpush3.bf16.msra.mxu1 %v4882_v12 }
 0x4b4   : > { %4884 = vmatprep.subr.bf16.mxu1 %v5647_v0 }
 0x4b7   : > { %4886 = vmatpush3.bf16.msra.mxu1 %v4885_v14 }
 0x4b8   : > { %4895 = vmatprep.subr.bf16.mxu1 %v5647_v0 }
 0x53c   : > { %v939_v16 = vpop.f32.mrb[4].mxu1 }
 0x53d   : > { %v4612_v17 = vpop.f32.mrb[5].mxu1 }
 0x540   : > { %v1105_v18 = vpop.f32.mrb[6].mxu1 }
 0x541   : > { %2106 = vrot.lane.b32.xlu1 %v1105_v18, %s6642_s22  ;;  %v4622_v19 = vpop.f32.mrb[7].mxu1  ;;  %s6708_s22 = smov 76  }
 0x544   : > { %v1271_v20 = vpop.f32.mrb[8].mxu1 }
 0x545   : > { %2110 = vrot.lane.b32.xlu0 %v1271_v20, %s6646_s19  ;;  %v4632_v21 = vpop.f32.mrb[9].mxu1 }
 0x575   : > { %v1437_v25 = vpop.f32.mrb[10].mxu1 }
 0x576   : > { %2114 = vrot.lane.b32.xlu1 %v1437_v25, %s6651_s1  ;;  %v4642_v28 = vpop.f32.mrb[11].mxu1  ;;  %s6714_s1 = smov 24  }
 0x579   : > { %v1603_v30 = vpop.f32.mrb[12].mxu1 }
 0x57a   : > { %2118 = vrot.lane.b32.xlu0 %v1603_v30, %s6653_s25  ;;  %v4652_v31 = vpop.f32.mrb[13].mxu1  ;;  %s4471_s25 = sshll.u32 %s6047_s21, 4  ;;  %s6713_s21 = smov 16  }
 0x57b   : > { %s680_s19 = scalar_lea.vmem %s6694_s20, %s4471_s25  ;;  %s6704_s20 = smov 84  }
 0x57c   : > { %v682_v9 = vld [vmem:[%s680_s19] sm:$0xff]  ;;  %v683_v10 = vld [vmem:[%s680_s19 + $0x8] sm:$0x3]  ;;  %s6705_s25 = smov 80   ;;  %s6709_s19 = smov 72  }
 0x57d   : > { %v1769_v32 = vpop.f32.mrb[14].mxu1 }
 0x57e   : > { %2122 = vrot.lane.b32.xlu1 %v1769_v32, %s6650_s23  ;;  %v4662_v33 = vpop.f32.mrb[15].mxu1  ;;  %s6711_s23 = smov 4  }
 0x581   : > { %v1935_v34 = vpop.f32.mrb[16].mxu1 }
 0x582   : > { %2126 = vrot.lane.b32.xlu0 %v1935_v34, %s6652_s0  ;;  %v4672_v35 = vpop.f32.mrb[17].mxu1  ;;  %s6706_s0 = smov 108  }
 0x585   : > { %v2101_v36 = vpop.f32.mrb[18].mxu1 }
 0x586   : > { %2130 = vrot.lane.b32.xlu1 %v2101_v36, %s6649_s17  ;;  %v4682_v37 = vpop.f32.mrb[19].mxu1  ;;  %s6712_s17 = smov 8  }
 0x5b3   : > { %v2107_v38 = vpop.permute.xlu1 %2106 }
 0x5b4   : > { %v2133_v42 = vsel %vm778_vm2, %v939_v16, %v2107_v38  ;;  %v4412_v38 = vld [vmem:[#allocation5] ss:$0 sm:$0xff] }
 0x5b7   : > { %v2111_v39 = vpop.permute.xlu0 %2110 }
 0x5b8   : > { %v2134_v43 = vsel %vm855_vm4, %v2133_v42, %v2111_v39 }
 0x5e8   : > { %v2115_v40 = vpop.permute.xlu1 %2114 }
 0x5e9   : > { %v2136_v45 = vsel %vm2135_vm5, %v2134_v43, %v2115_v40 }
 0x5ec   : > { %v2119_v41 = vpop.permute.xlu0 %2118 }
 0x5ed   : > { %v2138_v47 = vsel %vm2137_vm6, %v2136_v45, %v2119_v41 }
 0x5f0   : > { %v2123_v44 = vpop.permute.xlu1 %2122 }
 0x5f1   : > { %v2140_v48 = vsel %vm2139_vm7, %v2138_v47, %v2123_v44 }
 0x5f4   : > { %v2127_v46 = vpop.permute.xlu0 %2126 }
 0x5f5   : > { %v2142_v49 = vsel %vm2141_vm8, %v2140_v48, %v2127_v46 }
 0x5f8   : > { %v2131_v50 = vpop.permute.xlu1 %2130 }
 0x5f9   : > { %v2144_v51 = vsel %vm2143_vm9, %v2142_v49, %v2131_v50 }
 0x5fa   : > { %4692 = vmatmul.mubr.msk.f32.vlgmr.msra.gmra.mrb[14].mxu0 %vm695_vm1, %v2144_v51 }
 0x5fb   : > { %4713 = vmatprep.mubr.msk.f32.mxu0 %vm695_vm1, %v682_v9 }
 0x6cd   : > { %v2225_v53 = vpop.f32.mrb[14].mxu0 }
 0x6ce   : > { %v2226_v54 = vadd.f32 %v4408_v52, %v2225_v53  ;;  %v4693_v55 = vpop.f32.mrb[15].mxu0 }
 0x6d0   : > { %v2231_v11 = vadd.f32 %v2226_v54, %v6066_v8  ;;  %v4887_v8 = vpack.c.bf16 %v2348_v63, %v2347_v62 }
 0x6d2   : > { %v2232_v56 = vsel %vm695_vm1, %v2231_v11, 0.0  ;;  %4888 = vmatprep.subr.bf16.mxu0 %v4887_v8 }
 0x6d3   : > { %2233 = vadd.xlane.f32.xlu0 %v2232_v56  ;;  %4890 = vmatpush3.bf16.msra.mxu0 %v4887_v8 }
 0x6d4   : > { %4892 = vmatprep.subr.bf16.mxu0 %v4891_v4 }
 0x6d7   : > { %4894 = vmatpush3.bf16.msra.mxu0 %v4891_v4 }
 0x6d8   : > { %4899 = vmatprep.subr.bf16.mxu0 %v5647_v0 }
 0x6da   : > { %4714 = vmatmul.mubr.msk.f32.vlgmr.msra.gmra.mrb[16].mxu0 %vm695_vm1, %v683_v10 }
 0x6db   : > { %4727 = vmatprep.mubr.msk.f32.mxu0 %vm5648_vm0, %v5649_v1 }
 0x760   : > { %v2234_v57 = vpop.xlane.xlu0 %2233 }
 0x761   : > { %v2236_v58 = vmul.f32 0.03125, %v2234_v57 }
 0x763   : > { %v2237_v59 = vsub.f32 %v2231_v11, %v2236_v58 }
 0x765   : > { %v2238_v60 = vmul.f32 %v2237_v59, %v2237_v59  ;;  %v2256_v24 = vmul.f32 %v4410_v23, %v2237_v59 }
 0x767   : > { %v2239_v61 = vsel %vm695_vm1, %v2238_v60, 0.0 }
 0x768   : > { %2240 = vadd.xlane.f32.xlu1 %v2239_v61 }
 0x7ad   : > { %v4715_v30 = vpop.f32.mrb[16].mxu0 }
 0x7ae   : > { %v2436_v31 = vadd.f32 %v4715_v30, %v4414_v29  ;;  %v2430_v32 = vpop.f32.mrb[17].mxu0 }
 0x7af   : > { %v2431_v33 = vadd.f32 %v4414_v29, %v2430_v32 }
 0x7b1   : > { %v6320_v35 = vpack.i.bf16 %v2436_v31, %v2431_v33  ;;  %v4896_v36 = vpack.c.bf16 %v2436_v31, %v2431_v33 }
 0x7b3   : > { %5150 = vrot.lane.b32.xlu0 %v6320_v35, %s5651_s29 }
 0x7f5   : > { %v2241_v15 = vpop.xlane.xlu1 %2240 }
 0x7f6   : > { %v2242_v16 = vmul.f32 0.032258064, %v2241_v15 }
 0x7f8   : > { %5256 = vrsqrt.f32 %v2242_v16  ;;  %vm2245_vm10 = vcmp.eq.f32.partialorder %v2242_v16, inf  ;;  %v2248_v19 = vand.u32 2147483648, %v2242_v16  ;;  %vm2247_vm11 = vcmp.eq.f32.partialorder %v2242_v16, 0.0 }
 0x802   : > { %v5257_v17 = vpop.eup %5256 }
 0x803   : > { %v2244_v18 = vmul.f32 %v5257_v17, %v2242_v16 }
 0x805   : > { %v2246_v20 = vsel %vm2245_vm10, %v2242_v16, %v2244_v18 }
 0x806   : > { %v2249_v21 = vsel %vm2247_vm11, %v2248_v19, %v2246_v20 }
 0x807   : > { %v2250_v22 = vadd.f32 1e-06, %v2249_v21 }
 0x809   : > { %5258 = vrcp.f32 %v2250_v22 }
 0x813   : > { %v5259_v25 = vpop.eup %5258 }
 0x814   : > { %v2257_v27 = vmul.f32 %v5259_v25, %v2256_v24 }
 0x816   : > { %v6308_v28 = vadd.f32 %v4411_v26, %v2257_v27 }
 0x818   : > { %4703 = vmatmul.mubr.msk.f32.vlgmr.msra.gmra.mrb[20].mxu1 %vm695_vm1, %v6308_v28 }
 0x819   : > { %4720 = vmatprep.mubr.msk.f32.mxu1 %vm5648_vm0, %v5649_v1  ;;  %4898 = vmatpush3.bf16.xpose.msk.msra.mxu1 %vm6316_vm12, %v4896_v36 }
 0x81a   : > { %4903 = vmatprep.subr.bf16.mxu1 %v5647_v0 }
 0x825   : > { %v5151_v37 = vpop.permute.xlu0 %5150 }
 0x826   : > { %v5153_v39 = vunpack.i.h.bf16 %v5151_v37  ;;  %v5152_v40 = vunpack.i.l.bf16 %v5151_v37 }
 0x828   : > { %v4904_v44 = vpack.c.bf16 %v5153_v39, %v5152_v40 }
 0x8eb   : > { %v2343_v41 = vpop.f32.mrb[20].mxu1 }
 0x8ec   : > { %v2344_v42 = vadd.f32 %v4412_v38, %v2343_v41  ;;  %v4704_v43 = vpop.f32.mrb[21].mxu1 }
 0x8ee   : > { %v6327_v45 = vmul.f32 0.5, %v2344_v42 }
 0x8f0   : > { %2612 = vrot.lane.b32.xlu1 %v6327_v45, %s5651_s29  ;;  %4721 = vmatmul.mubr.msk.f32.vlgmr.msra.gmra.mrb[22].mxu1 %vm778_vm2, %v6327_v45  ;;  %s6697_s29 = smov 120  }
 0x8f1   : > { %4906 = vmatpush3.bf16.xpose.msk.msra.mxu1 %vm6316_vm12, %v4904_v44  ;;  %4734 = vmatprep.mubr.msk.f32.mxu1 %vm5648_vm0, %v5649_v1 }
 0x8f2   : > { %4915 = vmatprep.subr.bf16.mxu1 %v5647_v0 }
 0x962   : > { %v2613_v46 = vpop.permute.xlu1 %2612 }
 0x963   : > { %4735 = vmatmul.mubr.msk.f32.vlgmr.msra.gmra.mrb[24].mxu1 %vm778_vm2, %v2613_v46 }
 0x964   : > { %4755 = vmatprep.mubr.msk.f32.mxu1 %vm5648_vm0, %v5649_v1 }
 0x9c3   : > { %v2515_v47 = vpop.f32.mrb[22].mxu1 }
 0x9c4   : > { %v4722_v48 = vpop.f32.mrb[23].mxu1  ;;  %v2520_v49 = vsel %vm2519_vm13, %v2515_v47, -inf }
 0x9c5   : > { %2521 = vmax.xlane.f32.xlu0 %v2520_v49 }
 0xa36   : > { %v2690_v50 = vpop.f32.mrb[24].mxu1 }
 0xa37   : > { %v4736_v51 = vpop.f32.mrb[25].mxu1  ;;  %v2694_v52 = vsel %vm2519_vm13, %v2690_v50, -inf }
 0xa38   : > { %2695 = vmax.xlane.f32.xlu1 %v2694_v52 }
 0xa49   : > { %5155 = vrot.lane.b32.xlu1 %v6320_v35, %s5650_s18  ;;  %s6700_s18 = smov 92  }
 0xa4d   : > { %5165 = vrot.lane.b32.xlu1 %v6320_v35, %s6697_s29 }
 0xa51   : > { %2785 = vrot.lane.b32.xlu1 %v6327_v45, %s6697_s29  ;;  %s6715_s29 = smov 68  }
 0xa52   : > { %v2522_v53 = vpop.xlane.xlu0 %2521 }
 0xa53   : > { %v2523_v54 = vsub.f32 %v2515_v47, %v2522_v53 }
 0xa55   : > { %v2524_v55 = vmul.f32 1.442695, %v2523_v54 }
 0xa57   : > { %5260 = vpow2.f32 %v2524_v55 }
 0xa61   : > { %v5261_v11 = vpop.eup %5260 }
 0xa62   : > { %v2526_v56 = vsel %vm2519_vm13, %v5261_v11, 0.0 }
 0xa63   : > { %2527 = vadd.xlane.f32.xlu0 %v2526_v56 }
 0xac5   : > { %v2696_v57 = vpop.xlane.xlu1 %2695 }
 0xac6   : > { %v2697_v58 = vsub.f32 %v2690_v50, %v2696_v57 }
 0xac8   : > { %v2698_v59 = vmul.f32 1.442695, %v2697_v58 }
 0xac9   : > { %v5156_v60 = vpop.permute.xlu1 %5155 }
 0xaca   : > { %5262 = vpow2.f32 %v2698_v59  ;;  %v5158_v61 = vunpack.i.h.bf16 %v5156_v60  ;;  %v5157_v62 = vunpack.i.l.bf16 %v5156_v60 }
 0xacc   : > { %v4900_v8 = vpack.c.bf16 %v5158_v61, %v5157_v62 }
 0xacd   : > { %v5166_v14 = vpop.permute.xlu1 %5165 }
 0xace   : > { %4902 = vmatpush3.bf16.msk.msra.mxu0 %vm6350_vm3, %v4900_v8  ;;  %v5168_v16 = vunpack.i.h.bf16 %v5166_v14  ;;  %v5167_v17 = vunpack.i.l.bf16 %v5166_v14 }
 0xacf   : > { %4907 = vmatprep.subr.bf16.mxu0 %v5647_v0 }
 0xad0   : > { %v4912_v19 = vpack.c.bf16 %v5168_v16, %v5167_v17 }
 0xad1   : > { %v2786_v20 = vpop.permute.xlu1 %2785 }
 0xad4   : > { %v5263_v2 = vpop.eup %5262 }
 0xad5   : > { %v2700_v3 = vsel %vm2519_vm13, %v5263_v2, 0.0 }
 0xad6   : > { %2701 = vadd.xlane.f32.xlu0 %v2700_v3 }
 0xaec   : > { %5160 = vrot.lane.b32.xlu0 %v6320_v35, %s6700_s18  ;;  %s6716_s18 = smov 12  }
 0xaf0   : > { %v2528_v4 = vpop.xlane.xlu0 %2527 }
 0xaf1   : > { %5264 = vrcp.f32 %v2528_v4 }
 0xafb   : > { %v5265_v5 = vpop.eup %5264 }
 0xafc   : > { %v2530_v6 = vmul.f32 %v5265_v5, %v5261_v11 }
 0xafe   : > { %4728 = vmatmul.mubr.msk.f32.vlgmr.msra.gmra.mrb[18].mxu0 %vm2519_vm13, %v2530_v6 }
 0xaff   : > { %4741 = vmatprep.mubr.msk.f32.mxu0 %vm5648_vm0, %v5649_v1 }
 0xb63   : > { %v2702_v7 = vpop.xlane.xlu0 %2701 }
 0xb64   : > { %5266 = vrcp.f32 %v2702_v7 }
 0xb67   : > { %v5161_v9 = vpop.permute.xlu0 %5160 }
 0xb68   : > { %v5163_v10 = vunpack.i.h.bf16 %v5161_v9  ;;  %v5162_v12 = vunpack.i.l.bf16 %v5161_v9 }
 0xb6a   : > { %v4908_v13 = vpack.c.bf16 %v5163_v10, %v5162_v12 }
 0xb6c   : > { %4910 = vmatpush3.bf16.msk.msra.mxu0 %vm6350_vm3, %v4908_v13 }
 0xb6d   : > { %4911 = vmatprep.subr.bf16.mxu0 %v5647_v0 }
 0xb6e   : > { %v5267_v15 = vpop.eup %5266 }
 0xb6f   : > { %v2704_v18 = vmul.f32 %v5267_v15, %v5263_v2 }
 0xb71   : > { %4742 = vmatmul.mubr.msk.f32.vlgmr.msra.gmra.mrb[20].mxu0 %vm2519_vm13, %v2704_v18 }
 0xb72   : > { %4748 = vmatprep.mubr.msk.f32.mxu0 %vm5648_vm0, %v5649_v1 }
 0xb75   : > { %4914 = vmatpush3.bf16.xpose.msk.msra.mxu0 %vm6316_vm12, %v4912_v19 }
 0xb76   : > { %4923 = vmatprep.subr.bf16.mxu0 %v5647_v0 }
 0xb7c   : > { %4749 = vmatmul.mubr.msk.f32.vlgmr.msra.gmra.mrb[22].mxu0 %vm778_vm2, %v2786_v20 }
 0xb7d   : > { %4769 = vmatprep.mubr.msk.f32.mxu0 %vm5648_vm0, %v5649_v1 }
 0xbd1   : > { %v6375_v21 = vpop.f32.mrb[18].mxu0 }
 0xbd2   : > { %v4729_v22 = vpop.f32.mrb[19].mxu0 }
 0xc44   : > { %v6377_v23 = vpop.f32.mrb[20].mxu0 }
 0xc45   : > { %v4743_v24 = vpop.f32.mrb[21].mxu0 }
 0xc4f   : > { %v2863_v25 = vpop.f32.mrb[22].mxu0 }
 0xc50   : > { %v4750_v26 = vpop.f32.mrb[23].mxu0  ;;  %v2867_v27 = vsel %vm2519_vm13, %v2863_v25, -inf }
 0xc51   : > { %2868 = vmax.xlane.f32.xlu0 %v2867_v27 }
 0xc67   : > { %5170 = vrot.lane.b32.xlu0 %v6320_v35, %s6701_s27  ;;  %s6717_s27 = smov 20  }
 0xc6b   : > { %2958 = vrot.lane.b32.xlu0 %v6327_v45, %s6702_s30 }
 0xcde   : > { %v2869_v29 = vpop.xlane.xlu0 %2868 }
 0xcdf   : > { %v2870_v30 = vsub.f32 %v2863_v25, %v2869_v29 }
 0xce1   : > { %v2871_v31 = vmul.f32 1.442695, %v2870_v30 }
 0xce2   : > { %v5171_v32 = vpop.permute.xlu0 %5170 }
 0xce3   : > { %5268 = vpow2.f32 %v2871_v31  ;;  %v5173_v33 = vunpack.i.h.bf16 %v5171_v32  ;;  %v5172_v36 = vunpack.i.l.bf16 %v5171_v32 }
 0xce5   : > { %v4916_v37 = vpack.c.bf16 %v5173_v33, %v5172_v36 }
 0xce6   : > { %v2959_v48 = vpop.permute.xlu0 %2958 }
 0xce7   : > { %4918 = vmatpush3.bf16.msk.msra.mxu1 %vm6350_vm3, %v4916_v37 }
 0xce8   : > { %4919 = vmatprep.subr.bf16.mxu1 %v5647_v0 }
 0xced   : > { %v5269_v38 = vpop.eup %5268 }
 0xcee   : > { %v2873_v39 = vsel %vm2519_vm13, %v5269_v38, 0.0 }
 0xcef   : > { %2874 = vadd.xlane.f32.xlu1 %v2873_v39 }
 0xd00   : > { %5175 = vrot.lane.b32.xlu1 %v6320_v35, %s6702_s30  ;;  %s6718_s30 = smov 28  }
 0xd7c   : > { %v2875_v40 = vpop.xlane.xlu1 %2874 }
 0xd7d   : > { %5270 = vrcp.f32 %v2875_v40 }
 0xd80   : > { %v5176_v41 = vpop.permute.xlu1 %5175 }
 0xd81   : > { %v5178_v42 = vunpack.i.h.bf16 %v5176_v41  ;;  %v5177_v43 = vunpack.i.l.bf16 %v5176_v41 }
 0xd83   : > { %v4920_v47 = vpack.c.bf16 %v5178_v42, %v5177_v43 }
 0xd87   : > { %v5271_v44 = vpop.eup %5270 }
 0xd88   : > { %v2877_v46 = vmul.f32 %v5271_v44, %v5269_v38 }
 0xd8a   : > { %4756 = vmatmul.mubr.msk.f32.vlgmr.msra.gmra.mrb[26].mxu1 %vm2519_vm13, %v2877_v46 }
 0xd8b   : > { %4922 = vmatpush3.bf16.xpose.msk.msra.mxu1 %vm6316_vm12, %v4920_v47  ;;  %4762 = vmatprep.mubr.msk.f32.mxu1 %vm5648_vm0, %v5649_v1 }
 0xd8c   : > { %4931 = vmatprep.subr.bf16.mxu1 %v5647_v0 }
 0xd92   : > { %4763 = vmatmul.mubr.msk.f32.vlgmr.msra.gmra.mrb[28].mxu1 %vm778_vm2, %v2959_v48 }
 0xd93   : > { %4783 = vmatprep.mubr.msk.f32.mxu1 %vm5648_vm0, %v5649_v1 }
 0xe5d   : > { %v6399_v49 = vpop.f32.mrb[26].mxu1 }
 0xe5e   : > { %v4757_v50 = vpop.f32.mrb[27].mxu1 }
 0xe65   : > { %v3036_v51 = vpop.f32.mrb[28].mxu1 }
 0xe66   : > { %v4764_v52 = vpop.f32.mrb[29].mxu1  ;;  %v3040_v53 = vsel %vm2519_vm13, %v3036_v51, -inf }
 0xe67   : > { %3041 = vmax.xlane.f32.xlu1 %v3040_v53 }
 0xe78   : > { %5185 = vrot.lane.b32.xlu1 %v6320_v35, %s6703_s26 }
 0xe7c   : > { %3131 = vrot.lane.b32.xlu1 %v6327_v45, %s6703_s26  ;;  %s6719_s26 = sld [smem:[#allocation25_spill]] }
 0xef4   : > { %v3042_v54 = vpop.xlane.xlu1 %3041 }
 0xef5   : > { %v3043_v55 = vsub.f32 %v3036_v51, %v3042_v54 }
 0xef7   : > { %v3044_v11 = vmul.f32 1.442695, %v3043_v55 }
 0xef8   : > { %v5186_v8 = vpop.permute.xlu1 %5185 }
 0xef9   : > { %5272 = vpow2.f32 %v3044_v11  ;;  %v5188_v3 = vunpack.i.h.bf16 %v5186_v8  ;;  %v5187_v4 = vunpack.i.l.bf16 %v5186_v8 }
 0xefb   : > { %v4928_v6 = vpack.c.bf16 %v5188_v3, %v5187_v4 }
 0xefc   : > { %v3132_v7 = vpop.permute.xlu1 %3131 }
 0xf03   : > { %v5273_v56 = vpop.eup %5272 }
 0xf04   : > { %v3046_v57 = vsel %vm2519_vm13, %v5273_v56, 0.0 }
 0xf05   : > { %3047 = vadd.xlane.f32.xlu0 %v3046_v57 }
 0xf1b   : > { %5180 = vrot.lane.b32.xlu0 %v6320_v35, %s6704_s20  ;;  %s669_s20 = sand.u32 1, %s6719_s26  }
 0xf92   : > { %v3048_v58 = vpop.xlane.xlu0 %3047 }
 0xf93   : > { %5274 = vrcp.f32 %v3048_v58 }
 0xf96   : > { %v5181_v59 = vpop.permute.xlu0 %5180 }
 0xf97   : > { %v5183_v60 = vunpack.i.h.bf16 %v5181_v59  ;;  %v5182_v61 = vunpack.i.l.bf16 %v5181_v59 }
 0xf99   : > { %v4924_v62 = vpack.c.bf16 %v5183_v60, %v5182_v61 }
 0xf9b   : > { %4926 = vmatpush3.bf16.msk.msra.mxu0 %vm6350_vm3, %v4924_v62 }
 0xf9c   : > { %4927 = vmatprep.subr.bf16.mxu0 %v5647_v0 }
 0xf9d   : > { %v5275_v2 = vpop.eup %5274 }
 0xf9e   : > { %v3050_v5 = vmul.f32 %v5275_v2, %v5273_v56 }
 0xfa0   : > { %4770 = vmatmul.mubr.msk.f32.vlgmr.msra.gmra.mrb[24].mxu0 %vm2519_vm13, %v3050_v5 }
 0xfa1   : > { %4776 = vmatprep.mubr.msk.f32.mxu0 %vm5648_vm0, %v5649_v1 }
 0xfa4   : > { %4930 = vmatpush3.bf16.xpose.msk.msra.mxu0 %vm6316_vm12, %v4928_v6 }
 0xfa5   : > { %4939 = vmatprep.subr.bf16.mxu0 %v5647_v0 }
 0xfab   : > { %4777 = vmatmul.mubr.msk.f32.vlgmr.msra.gmra.mrb[26].mxu0 %vm778_vm2, %v3132_v7 }
 0xfac   : > { %4797 = vmatprep.mubr.msk.f32.mxu0 %vm5648_vm0, %v5649_v1 }
0x1073   : > { %v6421_v9 = vpop.f32.mrb[24].mxu0 }
0x1074   : > { %v4771_v10 = vpop.f32.mrb[25].mxu0 }
0x107e   : > { %v3209_v12 = vpop.f32.mrb[26].mxu0 }
0x107f   : > { %v4778_v13 = vpop.f32.mrb[27].mxu0  ;;  %v3213_v14 = vsel %vm2519_vm13, %v3209_v12, -inf }
0x1080   : > { %3214 = vmax.xlane.f32.xlu0 %v3213_v14 }
0x1096   : > { %5190 = vrot.lane.b32.xlu0 %v6320_v35, %s6705_s25  ;;  %s4378_s25 = sshll.u32 %s669_s20, 3 }
0x109a   : > { %3304 = vrot.lane.b32.xlu0 %v6327_v45, %s6706_s0 }
0x110d   : > { %v3215_v15 = vpop.xlane.xlu0 %3214 }
0x110e   : > { %v3216_v16 = vsub.f32 %v3209_v12, %v3215_v15 }
0x1110   : > { %v3217_v17 = vmul.f32 1.442695, %v3216_v16 }
0x1111   : > { %v5191_v18 = vpop.permute.xlu0 %5190 }
0x1112   : > { %5276 = vpow2.f32 %v3217_v17  ;;  %v5193_v19 = vunpack.i.h.bf16 %v5191_v18  ;;  %v5192_v20 = vunpack.i.l.bf16 %v5191_v18 }
0x1114   : > { %v4932_v22 = vpack.c.bf16 %v5193_v19, %v5192_v20 }
0x1115   : > { %v3305_v36 = vpop.permute.xlu0 %3304 }
0x1116   : > { %4934 = vmatpush3.bf16.msk.msra.mxu1 %vm6350_vm3, %v4932_v22 }
0x1117   : > { %4935 = vmatprep.subr.bf16.mxu1 %v5647_v0 }
0x111c   : > { %v5277_v24 = vpop.eup %5276 }
0x111d   : > { %v3219_v25 = vsel %vm2519_vm13, %v5277_v24, 0.0 }
0x111e   : > { %3220 = vadd.xlane.f32.xlu1 %v3219_v25 }
0x112f   : > { %5195 = vrot.lane.b32.xlu1 %v6320_v35, %s6706_s0  ;;  %s6720_s0 = sld [smem:[#allocation30_spill]] }
0x1135   : > { %p6722_p11 = scmp.ne.s32.totalorder %s6720_s0, 0 }
0x11ab   : > { %v3221_v26 = vpop.xlane.xlu1 %3220 }
0x11ac   : > { %5278 = vrcp.f32 %v3221_v26 }
0x11af   : > { %v5196_v27 = vpop.permute.xlu1 %5195 }
0x11b0   : > { %v5198_v29 = vunpack.i.h.bf16 %v5196_v27  ;;  %v5197_v30 = vunpack.i.l.bf16 %v5196_v27 }
0x11b2   : > { %v4936_v33 = vpack.c.bf16 %v5198_v29, %v5197_v30 }
0x11b6   : > { %v5279_v31 = vpop.eup %5278 }
0x11b7   : > { %v3223_v32 = vmul.f32 %v5279_v31, %v5277_v24 }
0x11b9   : > { %4784 = vmatmul.mubr.msk.f32.vlgmr.msra.gmra.mrb[30].mxu1 %vm2519_vm13, %v3223_v32 }
0x11ba   : > { %4938 = vmatpush3.bf16.xpose.msk.msra.mxu1 %vm6316_vm12, %v4936_v33  ;;  %4790 = vmatprep.mubr.msk.f32.mxu1 %vm5648_vm0, %v5649_v1 }
0x11bb   : > { %4947 = vmatprep.subr.bf16.mxu1 %v5647_v0 }
0x11c1   : > { %4791 = vmatmul.mubr.msk.f32.vlgmr.msra.gmra.mrb[32].mxu1 %vm778_vm2, %v3305_v36 }
0x11c2   : > { %4811 = vmatprep.mubr.msk.f32.mxu1 %vm5648_vm0, %v5649_v1 }
0x128c   : > { %v6443_v37 = vpop.f32.mrb[30].mxu1 }
0x128d   : > { %v4785_v38 = vpop.f32.mrb[31].mxu1 }
0x1294   : > { %v3382_v39 = vpop.f32.mrb[32].mxu1 }
0x1295   : > { %v4792_v40 = vpop.f32.mrb[33].mxu1  ;;  %v3386_v41 = vsel %vm2519_vm13, %v3382_v39, -inf }
0x1296   : > { %3387 = vmax.xlane.f32.xlu1 %v3386_v41  ;;  %v3860_v41 = vld [vmem:[#allocation8 + $0x10] sm:$0xff] }
0x12a7   : > { %5205 = vrot.lane.b32.xlu1 %v6320_v35, %s6707_s24 }
0x12ab   : > { %3477 = vrot.lane.b32.xlu1 %v6327_v45, %s6707_s24  ;;  %s4468_s24 = sshll.u32 %s5793_s28, 7  ;;  %s5681_s28 = smov [#allocation17]  }
0x1323   : > { %v3388_v42 = vpop.xlane.xlu1 %3387 }
0x1324   : > { %v3389_v43 = vsub.f32 %v3382_v39, %v3388_v42 }
0x1326   : > { %v3390_v44 = vmul.f32 1.442695, %v3389_v43  ;;  %v3861_v43 = vld [vmem:[#allocation8 + $0x18] sm:$0xff] }
0x1327   : > { %v5206_v54 = vpop.permute.xlu1 %5205 }
0x1328   : > { %5280 = vpow2.f32 %v3390_v44  ;;  %v5208_v11 = vunpack.i.h.bf16 %v5206_v54  ;;  %v5207_v56 = vunpack.i.l.bf16 %v5206_v54  ;;  %v4963_v44 = vpack.c.bf16 %v3861_v43, %v3860_v41 }
0x132a   : > { %v4944_v58 = vpack.c.bf16 %v5208_v11, %v5207_v56 }
0x132b   : > { %v3478_v59 = vpop.permute.xlu1 %3477 }
0x1332   : > { %v5281_v46 = vpop.eup %5280 }
0x1333   : > { %v3392_v47 = vsel %vm2519_vm13, %v5281_v46, 0.0 }
0x1334   : > { %3393 = vadd.xlane.f32.xlu0 %v3392_v47 }
0x134a   : > { %5200 = vrot.lane.b32.xlu0 %v6320_v35, %s6708_s22  ;;  %s671_s22 = scalar_lea.vmem [#allocation17], %s4378_s25 }
0x13c1   : > { %v3394_v48 = vpop.xlane.xlu0 %3393 }
0x13c2   : > { %5282 = vrcp.f32 %v3394_v48 }
0x13c5   : > { %v5201_v50 = vpop.permute.xlu0 %5200 }
0x13c6   : > { %v5203_v51 = vunpack.i.h.bf16 %v5201_v50  ;;  %v5202_v52 = vunpack.i.l.bf16 %v5201_v50 }
0x13c8   : > { %v4940_v53 = vpack.c.bf16 %v5203_v51, %v5202_v52 }
0x13ca   : > { %4942 = vmatpush3.bf16.msk.msra.mxu0 %vm6350_vm3, %v4940_v53 }
0x13cb   : > { %4943 = vmatprep.subr.bf16.mxu0 %v5647_v0 }
0x13cc   : > { %v5283_v55 = vpop.eup %5282 }
0x13cd   : > { %v3396_v57 = vmul.f32 %v5283_v55, %v5281_v46 }
0x13cf   : > { %4798 = vmatmul.mubr.msk.f32.vlgmr.msra.gmra.mrb[28].mxu0 %vm2519_vm13, %v3396_v57 }
0x13d0   : > { %4804 = vmatprep.mubr.msk.f32.mxu0 %vm5648_vm0, %v5649_v1 }
0x13d3   : > { %4946 = vmatpush3.bf16.xpose.msk.msra.mxu0 %vm6316_vm12, %v4944_v58 }
0x13d4   : > { %4955 = vmatprep.subr.bf16.mxu0 %v5647_v0 }
0x13da   : > { %4805 = vmatmul.mubr.msk.f32.vlgmr.msra.gmra.mrb[30].mxu0 %vm778_vm2, %v3478_v59 }
0x13db   : > { %4825 = vmatprep.mubr.msk.f32.mxu0 %vm5648_vm0, %v5649_v1 }
0x14a2   : > { %v3473_v60 = vpop.f32.mrb[28].mxu0 }
0x14a3   : > { %v4799_v61 = vpop.f32.mrb[29].mxu0 }
0x14ad   : > { %v3555_v62 = vpop.f32.mrb[30].mxu0 }
0x14ae   : > { %v4806_v8 = vpop.f32.mrb[31].mxu0  ;;  %v3559_v2 = vsel %vm2519_vm13, %v3555_v62, -inf }
0x14af   : > { %3560 = vmax.xlane.f32.xlu0 %v3559_v2 }
0x14c5   : > { %5210 = vrot.lane.b32.xlu0 %v6320_v35, %s6709_s19  ;;  %s4197_s19 = sshll.u32 %s671_s22, 4  ;;  %s6560_s19 = int_to_ptr.vmem [resolvable:$true] %s4197_s19 }
0x14c9   : > { %3650 = vrot.lane.b32.xlu0 %v6327_v45, %s6710_s7 }
0x153c   : > { %v3561_v3 = vpop.xlane.xlu0 %3560 }
0x153d   : > { %v3562_v4 = vsub.f32 %v3555_v62, %v3561_v3 }
0x153f   : > { %v3563_v5 = vmul.f32 1.442695, %v3562_v4 }
0x1540   : > { %v5211_v6 = vpop.permute.xlu0 %5210 }
0x1541   : > { %5284 = vpow2.f32 %v3563_v5  ;;  %v5213_v7 = vunpack.i.h.bf16 %v5211_v6  ;;  %v5212_v10 = vunpack.i.l.bf16 %v5211_v6 }
0x1543   : > { %v4948_v12 = vpack.c.bf16 %v5213_v7, %v5212_v10 }
0x1544   : > { %v3651_v22 = vpop.permute.xlu0 %3650 }
0x1545   : > { %4950 = vmatpush3.bf16.msk.msra.mxu1 %vm6350_vm3, %v4948_v12  ;;  %v3975_v12 = vld [vmem:[#allocation13] sm:$0xff] }
0x1546   : > { %4951 = vmatprep.subr.bf16.mxu1 %v5647_v0 }
0x154b   : > { %v5285_v13 = vpop.eup %5284 }
0x154c   : > { %v3565_v14 = vsel %vm2519_vm13, %v5285_v13, 0.0 }
0x154d   : > { %3566 = vadd.xlane.f32.xlu1 %v3565_v14  ;;  %v3977_v14 = vld [vmem:[#allocation13 + $0x10] sm:$0xff] }
0x155e   : > { %5215 = vrot.lane.b32.xlu1 %v6320_v35, %s6710_s7 }
0x15da   : > { %v3567_v45 = vpop.xlane.xlu1 %3566 }
0x15db   : > { %5286 = vrcp.f32 %v3567_v45  ;;  %v3978_v45 = vld [vmem:[#allocation13 + $0x18] sm:$0xff] }
0x15de   : > { %v5216_v15 = vpop.permute.xlu1 %5215 }
0x15df   : > { %v5218_v16 = vunpack.i.h.bf16 %v5216_v15  ;;  %v5217_v17 = vunpack.i.l.bf16 %v5216_v15  ;;  %v4969_v15 = vpack.c.bf16 %v3978_v45, %v3977_v14 }
0x15e1   : > { %v4952_v20 = vpack.c.bf16 %v5218_v16, %v5217_v17  ;;  %v4061_v16 = vld [vmem:[%s6616_s15 + $0x8] sm:$0xff]  ;;  %v4062_v17 = vld [vmem:[%s6616_s15 + $0x10] sm:$0xff] }
0x15e5   : > { %v5287_v18 = vpop.eup %5286 }
0x15e6   : > { %v3569_v19 = vmul.f32 %v5287_v18, %v5285_v13  ;;  %v3976_v13 = vld [vmem:[#allocation13 + $0x8] sm:$0xff] }
0x15e8   : > { %4812 = vmatmul.mubr.msk.f32.vlgmr.msra.gmra.mrb[34].mxu1 %vm2519_vm13, %v3569_v19  ;;  %v4063_v19 = vld [vmem:[%s6616_s15 + $0x18] sm:$0xff] }
0x15e9   : > { %4954 = vmatpush3.bf16.xpose.msk.msra.mxu1 %vm6316_vm12, %v4952_v20  ;;  %4818 = vmatprep.mubr.msk.f32.mxu1 %vm5648_vm0, %v5649_v1  ;;  %v4975_v20 = vpack.c.bf16 %v4063_v19, %v4062_v17 }
0x15ea   : > { %4965 = vmatprep.subr.bf16.mxu1 %v5647_v0 }
0x15f0   : > { %4819 = vmatmul.mubr.msk.f32.vlgmr.msra.gmra.mrb[36].mxu1 %vm778_vm2, %v3651_v22  ;;  %v4064_v22 = vld [vmem:[%s6616_s15 + $0x20] sm:$0xff] }
0x15f1   : > { %4847 = vmatprep.mubr.msk.f32.mxu1 %vm5648_vm0, %v5649_v1 }
0x16bb   : > { %v3646_v24 = vpop.f32.mrb[34].mxu1 }
0x16bc   : > { %v4813_v25 = vpop.f32.mrb[35].mxu1 }
0x16c3   : > { %v3728_v26 = vpop.f32.mrb[36].mxu1 }
0x16c4   : > { %v4820_v27 = vpop.f32.mrb[37].mxu1  ;;  %v3732_v29 = vsel %vm2519_vm13, %v3728_v26, -inf }
0x16c5   : > { %3733 = vmax.xlane.f32.xlu1 %v3732_v29 }
0x16d6   : > { %3824 = vrot.lane.b32.xlu1 %v6377_v23, %s6711_s23 }
0x16da   : > { %3828 = vrot.lane.b32.xlu1 %v6399_v49, %s6712_s17  ;;  %s6721_s17 = sld [smem:[#allocation35_spill]] }
0x16de   : > { %3836 = vrot.lane.b32.xlu1 %v6443_v37, %s6713_s21 }
0x16e0   : > { %s6558_s21 = scalar_lea.hbm %s6721_s17, %s4468_s24 }
0x16e2   : > { %3844 = vrot.lane.b32.xlu1 %v3646_v24, %s6714_s1  ;;  %v4065_v24 = vld [vmem:[%s6616_s15 + $0x28] sm:$0xff]  ;;  %s4184_s1 = scalar_lea.sflag [#allocation4], %s669_s20 }
0x16e3   : > { %v4978_v25 = vpack.c.bf16 %v4065_v24, %v4064_v22 }
0x1752   : > { %v3734_v34 = vpop.xlane.xlu1 %3733 }
0x1753   : > { %v3735_v30 = vsub.f32 %v3728_v26, %v3734_v34 }
0x1755   : > { %v3736_v31 = vmul.f32 1.442695, %v3735_v30 }
0x1756   : > { %v3825_v47 = vpop.permute.xlu1 %3824 }
0x1757   : > { %5288 = vpow2.f32 %v3736_v31  ;;  %v3851_v51 = vsel %vm778_vm2, %v6375_v21, %v3825_v47  ;;  %v4457_v21 = vld [vmem:[#allocation10] ss:$0 sm:$0xff] }
0x175a   : > { %v3829_v48 = vpop.permute.xlu1 %3828 }
0x175b   : > { %v3852_v52 = vsel %vm855_vm4, %v3851_v51, %v3829_v48  ;;  %vm4075_vm4 = vcmask 523264  }
0x175e   : > { %v3837_v53 = vpop.permute.xlu1 %3836 }
0x1761   : > { %v5289_v32 = vpop.eup %5288 }
0x1762   : > { %v3738_v33 = vsel %vm2519_vm13, %v5289_v32, 0.0  ;;  %v3845_v57 = vpop.permute.xlu1 %3844 }
0x1763   : > { %3739 = vadd.xlane.f32.xlu0 %v3738_v33 }
0x1779   : > { %5220 = vrot.lane.b32.xlu0 %v6320_v35, %s6715_s29  ;;  %v3858_v35 = vld [vmem:[#allocation8] sm:$0xff]  ;;  %s5552_s29 = scalar_lea.vmem %s6560_s19, 128 }
0x177a   : > { %p5553_p8 = scmp.ne.s32.totalorder %s6560_s19, %s5552_s29 }
0x177c   : > { %p5554_p13 = pnand %p5553_p8, %p6722_p11 }
0x177d   : > { %3832 = vrot.lane.b32.xlu0 %v6421_v9, %s6716_s18  ;;  %v3859_v9 = vld [vmem:[#allocation8 + $0x8] sm:$0xff]  ;;  %s5556_s18 = sshll.u32 %s5681_s28, 4  ;;  %s5557_s18 = int_to_ptr.vmem [resolvable:$false] %s5556_s18 }
0x177e   : > { %v4960_v42 = vpack.c.bf16 %v3859_v9, %v3858_v35  ;;  %v4461_v9 = vld [vmem:[#allocation14] ss:$0 sm:$0xff]  ;;  %p5555_p1 = pneg %p5554_p13  ;;  %p5559_p0 = scmp.lt.s32.totalorder %s6560_s19, %s5557_s18 }
0x1781   : > { %3840 = vrot.lane.b32.xlu0 %v3473_v60, %s6717_s27  ;;  %s5558_s27 = scalar_lea.vmem %s5557_s18, 256 }
0x1782   : > { %p5560_p6 = scmp.lt.s32.totalorder %s5558_s27, %s5552_s29 }
0x1784   : > { %p5561_p5 = por %p5560_p6, %p5559_p0 }
0x1786   : > { %p5562_p9 = pnand %p5561_p5, %p5555_p1 }
0x17f0   : > { %v3740_v23 = vpop.xlane.xlu0 %3739 }
0x17f1   : > { %5290 = vrcp.f32 %v3740_v23  ;;  %v4459_v23 = vld [vmem:[#allocation11 + $0x2] ss:$0 sm:$0xff] }
0x17f4   : > { %v5221_v49 = vpop.permute.xlu0 %5220 }
0x17f5   : > { %v5223_v36 = vunpack.i.h.bf16 %v5221_v49  ;;  %v5222_v37 = vunpack.i.l.bf16 %v5221_v49 }
0x17f7   : > { %v4956_v38 = vpack.c.bf16 %v5223_v36, %v5222_v37  ;;  %v4460_v37 = vld [vmem:[#allocation11 + $0x3] ss:$0 sm:$0xff] }
0x17f8   : > { %v3833_v50 = vpop.permute.xlu0 %3832 }
0x17f9   : > { %4958 = vmatpush3.bf16.msk.msra.mxu0 %vm6350_vm3, %v4956_v38  ;;  %v3853_v54 = vsel %vm2135_vm5, %v3852_v52, %v3833_v50 }
0x17fa   : > { %4959 = vmatprep.subr.bf16.mxu0 %v5647_v0  ;;  %v3854_v11 = vsel %vm2137_vm6, %v3853_v54, %v3837_v53 }
0x17fb   : > { %v5291_v39 = vpop.eup %5290 }
0x17fc   : > { %v3742_v40 = vmul.f32 %v5291_v39, %v5289_v32  ;;  %v3841_v55 = vpop.permute.xlu0 %3840 }
0x17fd   : > { %v3855_v56 = vsel %vm2139_vm7, %v3854_v11, %v3841_v55 }
0x17fe   : > { %4826 = vmatmul.mubr.msk.f32.vlgmr.msra.gmra.mrb[32].mxu0 %vm2519_vm13, %v3742_v40  ;;  %v3856_v59 = vsel %vm2141_vm8, %v3855_v56, %v3845_v57  ;;  %v4067_v40 = vld [vmem:[%s6616_s15 + $0x38] sm:$0xff] }
0x17ff   : > { %4836 = vmatprep.mubr.msk.f32.mxu0 %vm5648_vm0, %v5649_v1  ;;  %4961 = vmatpush3.bf16.msra.mxu0 %v4960_v42 }
0x1800   : > { %4962 = vmatprep.subr.bf16.mxu0 %v5647_v0 }
0x1803   : > { %4964 = vmatpush3.bf16.msra.mxu0 %v4963_v44 }
0x1804   : > { %4971 = vmatprep.subr.bf16.mxu0 %v5647_v0 }
0x18d1   : > { %v3819_v63 = vpop.f32.mrb[32].mxu0 }
0x18d2   : > { %3848 = vrot.lane.b32.xlu0 %v3819_v63, %s6718_s30  ;;  %v4827_v46 = vpop.f32.mrb[33].mxu0  ;;  %v4463_v63 = vld [vmem:[#allocation16] ss:$0 sm:$0xff] }
0x1944   : > { %v3849_v58 = vpop.permute.xlu0 %3848 }
0x1945   : > { %v3857_v60 = vsel %vm2143_vm9, %v3856_v59, %v3849_v58 }
0x1946   : > { %4837 = vmatmul.mubr.msk.f32.vlgmr.msra.gmra.mrb[34].mxu0 %vm695_vm1, %v3857_v60 }
0x1947   : > { %4866 = vmatprep.mubr.msk.f32.mxu0 %vm5648_vm0, %v5649_v1  ;;  %v4966_v1 = vpack.c.bf16 %v3976_v13, %v3975_v12 }
0x1949   : > { %4967 = vmatpush3.bf16.msra.mxu1 %v4966_v1 }
0x194a   : > { %4968 = vmatprep.subr.bf16.mxu1 %v5647_v0 }
0x194d   : > { %4970 = vmatpush3.bf16.msra.mxu1 %v4969_v15 }
0x1a19   : > { %v3938_v61 = vpop.f32.mrb[34].mxu0 }
0x1a1a   : > { %v3939_v62 = vadd.f32 %v4457_v21, %v3938_v61  ;;  %v4838_v8 = vpop.f32.mrb[35].mxu0 }
0x1a1b   : > { %v4465_v8 = vld [vmem:[#allocation11 + $0x4] ss:$0 sm:$0xff] }
0x1a1c   : > { %v3944_v2 = vadd.f32 %v3939_v62, %v6308_v28  ;;  %v4060_v28 = vld [vmem:[%s6616_s15] sm:$0xff] }
0x1a1d   : > { %v4972_v18 = vpack.c.bf16 %v4061_v16, %v4060_v28 }
0x1a1e   : > { %v3945_v3 = vsel %vm695_vm1, %v3944_v2, 0.0 }
0x1a1f   : > { %3946 = vadd.xlane.f32.xlu1 %v3945_v3  ;;  %4973 = vmatpush3.bf16.msra.mxu0 %v4972_v18 }
0x1a20   : > { %4974 = vmatprep.subr.bf16.mxu0 %v5647_v0 }
0x1a23   : > { %4976 = vmatpush3.bf16.msra.mxu0 %v4975_v20 }
0x1a24   : > { %4977 = vmatprep.subr.bf16.mxu0 %v5647_v0 }
0x1a27   : > { %4979 = vmatpush3.bf16.msra.mxu0 %v4978_v25 }
0x1a28   : > { %4980 = vmatprep.subr.bf16.mxu0 %v5647_v0  ;;  %v4066_v0 = vld [vmem:[%s6616_s15 + $0x30] sm:$0xff] }
0x1a29   : > { %v4981_v35 = vpack.c.bf16 %v4067_v40, %v4066_v0 }
0x1a2b   : > { %4982 = vmatpush3.bf16.msra.mxu0 %v4981_v35 }
0x1aac   : > { %v3947_v4 = vpop.xlane.xlu1 %3946 }
0x1aad   : > { %v3948_v5 = vmul.f32 0.03125, %v3947_v4  ;;  %v4466_v4 = vld [vmem:[#allocation11 + $0x5] ss:$0 sm:$0xff] }
0x1aaf   : > { %v3949_v6 = vsub.f32 %v3944_v2, %v3948_v5 }
0x1ab1   : > { %v3950_v7 = vmul.f32 %v3949_v6, %v3949_v6  ;;  %v3968_v49 = vmul.f32 %v4459_v23, %v3949_v6 }
0x1ab3   : > { %v3951_v10 = vsel %vm695_vm1, %v3950_v7, 0.0 }
0x1ab4   : > { %3952 = vadd.xlane.f32.xlu0 %v3951_v10 }
0x1b41   : > { %v3953_v26 = vpop.xlane.xlu0 %3952 }
0x1b42   : > { %v3954_v27 = vmul.f32 0.032258064, %v3953_v26 }
0x1b44   : > { %5292 = vrsqrt.f32 %v3954_v27  ;;  %vm3957_vm0 = vcmp.eq.f32.partialorder %v3954_v27, inf  ;;  %v3960_v30 = vand.u32 2147483648, %v3954_v27  ;;  %vm3959_vm2 = vcmp.eq.f32.partialorder %v3954_v27, 0.0 }
0x1b4e   : > { %v5293_v29 = vpop.eup %5292 }
0x1b4f   : > { %v3956_v34 = vmul.f32 %v5293_v29, %v3954_v27 }
0x1b51   : > { %v3958_v31 = vsel %vm3957_vm0, %v3954_v27, %v3956_v34 }
0x1b52   : > { %v3961_v32 = vsel %vm3959_vm2, %v3960_v30, %v3958_v31 }
0x1b53   : > { %v3962_v33 = vadd.f32 1e-06, %v3961_v32 }
0x1b55   : > { %5294 = vrcp.f32 %v3962_v33 }
0x1b5f   : > { %v5295_v36 = vpop.eup %5294 }
0x1b60   : > { %v3969_v38 = vmul.f32 %v5295_v36, %v3968_v49 }
0x1b62   : > { %v3974_v39 = vadd.f32 %v4460_v37, %v3969_v38 }
0x1b64   : > { %4848 = vmatmul.mubr.msk.f32.vlgmr.msra.gmra.mrb[38].mxu1 %vm695_vm1, %v3974_v39 }
0x1c37   : > { %v4055_v41 = vpop.f32.mrb[38].mxu1 }
0x1c38   : > { %v4056_v42 = vadd.f32 %v4461_v9, %v4055_v41  ;;  %v4849_v43 = vpop.f32.mrb[39].mxu1 }
0x1c3a   : > { %v4059_v44 = vmax.f32 %v4056_v42, 0.0 }
0x1c3c   : > { %4867 = vmatmul.mubr.msk.f32.vlgmr.msra.gmra.mrb[36].mxu0 %vm4075_vm4, %v4059_v44 }
0x1d0f   : > { %v4145_v46 = vpop.f32.mrb[36].mxu0 }
0x1d10   : > { %v4146_v47 = vadd.f32 %v4463_v63, %v4145_v46  ;;  %v4868_v48 = vpop.f32.mrb[37].mxu0 }
0x1d12   : > { %v4151_v50 = vadd.f32 %v4146_v47, %v3974_v39 }
0x1d14   : > { %v4152_v51 = vsel %vm695_vm1, %v4151_v50, 0.0 }
0x1d15   : > { %4153 = vadd.xlane.f32.xlu0 %v4152_v51 }
0x1da2   : > { %v4154_v52 = vpop.xlane.xlu0 %4153 }
0x1da3   : > { %v4155_v53 = vmul.f32 0.03125, %v4154_v52 }
0x1da5   : > { %v4156_v54 = vsub.f32 %v4151_v50, %v4155_v53 }
0x1da7   : > { %v4157_v55 = vmul.f32 %v4156_v54, %v4156_v54  ;;  %v4175_v2 = vmul.f32 %v4465_v8, %v4156_v54 }
0x1da9   : > { %v4158_v11 = vsel %vm695_vm1, %v4157_v55, 0.0 }
0x1daa   : > { %4159 = vadd.xlane.f32.xlu1 %v4158_v11 }
0x1e37   : > { %v4160_v56 = vpop.xlane.xlu1 %4159 }
0x1e38   : > { %v4161_v57 = vmul.f32 0.032258064, %v4160_v56 }
0x1e3a   : > { %5296 = vrsqrt.f32 %v4161_v57  ;;  %vm4164_vm5 = vcmp.eq.f32.partialorder %v4161_v57, inf  ;;  %v4167_v60 = vand.u32 2147483648, %v4161_v57  ;;  %vm4166_vm6 = vcmp.eq.f32.partialorder %v4161_v57, 0.0 }
0x1e44   : > { %v5297_v58 = vpop.eup %5296 }
0x1e45   : > { %v4163_v59 = vmul.f32 %v5297_v58, %v4161_v57 }
0x1e47   : > { %v4165_v21 = vsel %vm4164_vm5, %v4161_v57, %v4163_v59 }
0x1e48   : > { %v4168_v61 = vsel %vm4166_vm6, %v4167_v60, %v4165_v21 }
0x1e49   : > { %v4169_v62 = vadd.f32 1e-06, %v4168_v61 }
0x1e4b   : > { %5298 = vrcp.f32 %v4169_v62 }
0x1e55   : > { %v5299_v3 = vpop.eup %5298 }
0x1e56   : > { %v4176_v5 = vmul.f32 %v5299_v3, %v4175_v2 }
0x1e58   : > { %v4181_v6 = vadd.f32 %v4466_v4, %v4176_v5 }
0x1e5a   : > { %4182 = vst.msk [vmem:[%s671_s22] sm:$0xff] %vm695_vm1, %v4181_v6 }
0x1e5b   : > { %5565 = shalt.err (!%p5562_p9)
}
0x1e5c   : > { %s5566_s30 = scalar_lea.hbm %s6558_s21, 128  ;;  %s5570_s25 = scalar_lea.hbm %s6721_s17, 256 }
0x1e5d   : > { %p5567_p12 = scmp.ne.s32.totalorder %s6558_s21, %s5566_s30  ;;  %p5571_p3 = scmp.lt.u32.totalorder %s6558_s21, %s6721_s17 }
0x1e5e   : > { %p5572_p4 = scmp.lt.u32.totalorder %s5570_s25, %s5566_s30  ;;  %p5574_p8 = scmp.lt.u32.totalorder %s5566_s30, %s6558_s21 }
0x1e5f   : > { %p5568_p10 = pnand %p5567_p12, %p6722_p11 }
0x1e60   : > { %p5573_p7 = por %p5572_p4, %p5571_p3 }
0x1e61   : > { %p5569_p2 = pneg %p5568_p10 }
0x1e62   : > { %p5575_p13 = por %p5574_p8, %p5573_p7 }
0x1e64   : > { %p5576_p1 = pnand %p5575_p13, %p5569_p2 }
0x1e66   : > { %5579 = shalt.err (!%p5576_p1)
}
0x1e67   : > { %5019 = dma.vmem_to_hbm [thread:$0]  (%p6722_p11), %s6560_s19, 128, %s6558_s21, %s4184_s1  }
0x1e68 PF: > { %s6723_s7 = sld [smem:[#allocation27_spill]]  ;;  %s6724_s23 = sld [smem:[#allocation24_spill]] }
0x1e69   : > { %s6725_s29 = sld [smem:[#allocation31_spill]] }
0x1e6e   : > { %p5071_p0 = scmp.ge.s32.totalorder %s6723_s7, 2  ;;  %s4209_s28 = sand.u32 1, %s6724_s23  }
0x1e6f   : > { %p6726_p6 = scmp.ne.s32.totalorder %s6725_s29, 0  ;;  %s4210_s18 = scalar_lea.sflag [#allocation4], %s4209_s28 }
0x1e71   : > { %p5050_p5 = pnand %p5071_p0, %p6726_p6 }
0x1e73   : > { %5617 = dma.done.wait (!%p5050_p5), %s4210_s18, 128  }
0x1e74   : > { %5619 = vsyncadd (!%p5050_p5), %s4210_s18, 4294967168  ;;  %s6727_s27 = sld [smem:[#allocation28_spill]]  ;;  %s6728_s24 = sld [smem:[#allocation25_spill]] }
0x1e75   : > { %s6729_s25 = sld [smem:[#allocation26_spill]]  ;;  %s6730_s26 = sld [smem:[#allocation29_spill]] }
0x1e7a   : > { %p32_p9 = scmp.ge.s32.totalorder %s6727_s27, 4  }
0x1e7c   :  { %34 = sbr.rel (!%p32_p9) target bundleno = 13 (0xd), region = 163 }
0x1e83   :  { %4215 = vsyncpa [#allocation3], 1 }
0x1e84   :  { %4217 = vsyncpa [#allocation3 + $0x1], 1 }
0x1e85   :  { %4218 = vsyncpa [#allocation6], 1 }
0x1e86   :  { %4219 = vsyncpa [#allocation9], 1 }
0x1e87   :  { %4220 = vsyncpa [#allocation12], 1 }
0x1e88   :  { %4221 = vsyncpa [#allocation15], 1 }
0x1e89   :  { %4222 = vsyncpa [#allocation4], 1 }
0x1e8a   :  { %4224 = vsyncpa [#allocation4 + $0x1], 1 }

</bundles_post_ra>
